<compile_context>
chip_gen: v5e
topology: v5e:2x2
jax: 0.10.0
libtpu: 0.0.40
codegen_flags: <defaults>
</compile_context>

<pallas_src>
import jax
import jax.numpy as jnp
from jax import lax
from jax.experimental import pallas as pl
from jax.experimental.pallas import tpu as pltpu


# ----------------------------- fused Pallas kernel --------------------------

def _fused_forward_kernel(p_ref, wf_ref, bf_ref, w1_ref, b1_ref, w2_ref, b2_ref,
                          omf_ref, feat_ref, wp_ref):
    n_batch = feat_ref.shape[0]          # N
    half = wp_ref.shape[0]               # N * Wpool (one W-parity half)
    shift = wf_ref.shape[1] // 2         # 2 * oc

    # (1) 4 multi-scale convs + 1x1 layer0, pre-folded on the host into one
    #     (1024, 4*oc) bf16 weight -> a single MXU matmul (f32 accumulate) + ReLU.
    y = jnp.dot(p_ref[...], wf_ref[...],
                preferred_element_type=jnp.float32) + bf_ref[...]
    y = jnp.maximum(y, 0.0)                          # rows = (parity, wpool, n)
    omf_ref[...] = y                                 # output 1 (host un-permutes)

    # (2) MaxPool2d(2,2), all at full 128-lane width:
    #     concat-H pool: groups are host-ordered [g0,g2,g1,g3], so rolling by
    #     2*oc lanes and taking the max puts [max(g0,g1) | max(g2,g3)] in lanes
    #     0..63 (lanes 64..127 hold a duplicate, zeroed out in w1_ref).
    pm = jnp.maximum(y, pltpu.roll(y, shift=shift, axis=1))
    #     W pool: the two W-parities are the two contiguous row halves.
    wp_ref[...] = jnp.maximum(pm[:half, :], pm[half:, :])   # rows = (wpool, n)

    # (3) layer_end Conv2d(oc,64,(2,16),stride=3) as 16 accumulated MXU dots
    #     over the kernel-width offset pw (single output window here), reading
    #     contiguous N-row slices of the pooled-map scratch.
    # TODO(synk): for pooled widths giving >1 conv output column, gather the
    # strided (3*t + pw) rows here instead of assuming the single window at 0.
    acc = b1_ref[...]                                        # (1, 128), zero-padded bias
    for pw in range(w1_ref.shape[0]):
        acc = acc + jnp.dot(wp_ref[pl.ds(pw * n_batch, n_batch), :], w1_ref[pw],
                            preferred_element_type=jnp.float32)
    h = jnp.maximum(acc, 0.0)                                # (N, 128), lane-dense

    # (4) layer_end 1x1 Conv (64->128) + ReLU (weights zero-row-padded to 128).
    feat_ref[...] = jnp.maximum(
        jnp.dot(h, w2_ref[...], preferred_element_type=jnp.float32) + b2_ref[...], 0.0)


def fused_forward_block(P, prep, *, n_batch, w_pool):
    R, _ = P.shape                         # R = 2 * Wpool * N
    C = prep["Wfused"].shape[1]            # 4 * oc = 128
    C2 = prep["We2"].shape[1]              # 128
    # Grid-less single-block call: whole arrays live in VMEM (working set < 2 MiB
    # on every generation), no pipeline prologue/epilogue, no double-buffering.
    # TODO(synk): for large N*Wout, tile the first matmul over row blocks with a
    # "parallel" grid axis (2 TCs on v7x) sized against v7x's 64 MiB VMEM.
    return pl.pallas_call(
        _fused_forward_kernel,
        out_shape=(jax.ShapeDtypeStruct((R, C), jnp.float32),
                   jax.ShapeDtypeStruct((n_batch, C2), jnp.float32)),
        scratch_shapes=[pltpu.VMEM((n_batch * w_pool, C), jnp.float32)],
    )(P, prep["Wfused"], prep["bfused"], prep["W1p"], prep["be1"],
      prep["We2"], prep["be2"])


# ----------------------------- parameters / prep ----------------------------

def init_params(key, in_channels=1, oc=32):
    ks = jax.random.split(key, 14)

    def w(k, shape):
        fan_in = shape[1] * shape[2] * shape[3]
        return jax.random.normal(k, shape, jnp.float32) / jnp.sqrt(fan_in)

    def b(k, n):
        return jax.random.normal(k, (n,), jnp.float32) * 0.01

    return dict(
        W1=w(ks[0], (oc, in_channels, 8, 16)),   b1=b(ks[1], oc),
        W2=w(ks[2], (oc, in_channels, 8, 32)),   b2=b(ks[3], oc),
        W3=w(ks[4], (oc, in_channels, 8, 64)),   b3=b(ks[5], oc),
        W4=w(ks[6], (oc, in_channels, 8, 128)),  b4=b(ks[7], oc),
        W0=w(ks[8], (oc, oc, 1, 1)),             b0=b(ks[9], oc),
        We1=w(ks[10], (64, 32, 2, 16)),          be1=b(ks[11], 64),
        We2=w(ks[12], (128, 64, 1, 1)),          be2=b(ks[13], 128),
    )


GROUP_PERM = (0, 2, 1, 3)   # column order of the 4 branches inside the kernel
                            # (self-inverse; lets the H-pool be roll(., 2*oc)+max)


def prepare_params(p):
    """Once-per-model weight packing, hoisted off the per-call forward path."""
    oc = p["W1"].shape[0]

    # 4 multi-scale conv weights -> one (8*128, 4*oc) matrix, columns in
    # GROUP_PERM order; each kernel padded into the shared 128-wide window.
    Ws = [p["W1"], p["W2"], p["W3"], p["W4"]]
    bs = [p["b1"], p["b2"], p["b3"], p["b4"]]
    cols, biases = [], []
    for g in GROUP_PERM:
        Wk, bk = Ws[g], bs[g]
        kw = Wk.shape[3]
        off = (128 - kw) // 2                     # = 56 - torch_pad
        Wpad = jnp.pad(Wk[:, 0], ((0, 0), (0, 0), (off, 128 - kw - off)))  # (oc,8,128)
        cols.append(Wpad.reshape(oc, 8 * 128).T)
        biases.append(bk)
    Wms = jnp.concatenate(cols, axis=1)           # (1024, 4*oc)
    bms = jnp.concatenate(biases)[None, :]        # (1, 4*oc)

    # layer0 (1x1 conv per concat-H row) == block-diagonal matmul; no
    # nonlinearity in between -> fold exactly (same W0 for every block, so the
    # group permutation is irrelevant here).
    W0sq = p["W0"][:, :, 0, 0]
    W0bd = jax.scipy.linalg.block_diag(*([W0sq.T] * 4))            # (4*oc, 4*oc)
    b0bd = jnp.tile(p["b0"], 4)[None, :]
    Wfused = jnp.dot(Wms, W0bd, precision=lax.Precision.HIGHEST)   # (1024, 4*oc)
    bfused = jnp.dot(bms, W0bd, precision=lax.Precision.HIGHEST) + b0bd

    # layer_end conv1 (2,16): one (128, 128) weight slab per kernel-width offset.
    # Rows = pooled-map lanes [H-row0 chans | H-row1 chans | dup | dup] (dup half
    # zeroed); cols = 64 real output channels zero-padded to 128 (lane-dense h).
    kw1 = p["We1"].shape[3]
    W1p = jnp.zeros((kw1, 4 * oc, 128), jnp.float32)
    W1p = W1p.at[:, 0 * oc:1 * oc, 0:64].set(jnp.transpose(p["We1"][:, :, 0, :], (2, 1, 0)))
    W1p = W1p.at[:, 1 * oc:2 * oc, 0:64].set(jnp.transpose(p["We1"][:, :, 1, :], (2, 1, 0)))
    be1 = jnp.zeros((1, 128), jnp.float32).at[0, :64].set(p["be1"])

    # layer_end conv2 (1x1, 64->128): zero-row-pad input dim to 128.
    We2 = jnp.zeros((128, 128), jnp.float32).at[:64, :].set(p["We2"][:, :, 0, 0].T)
    be2 = p["be2"][None, :]

    return dict(Wfused=Wfused.astype(jnp.bfloat16), bfused=bfused,
                W1p=W1p, be1=be1, We2=We2, be2=be2)


# ----------------------------- forward ---------------------------------------

def multi_features_forward(x, prep):
    N, Cin, H, W = x.shape
    assert Cin == 1 and H == 8, "module assumes 1 input channel, kernel height 8"
    oc = prep["Wfused"].shape[1] // 4
    Wout = (W - 16) // 16 + 1
    assert Wout % 2 == 0, "2x2 max-pool needs an even conv output width"
    Wp = Wout // 2                                   # pooled width
    Wout2 = (Wp - 16) // 3 + 1                       # layer_end conv output width
    assert Wout2 == 1, "kernel implements the single layer_end window case"

    # im2col glue: one shared 8x128 patch per output column (pad W by 56 each
    # side so every kernel width sits at its relative offset inside the patch).
    # Rows are ordered (w-parity, pooled-w, batch) so the in-kernel W pool is a
    # contiguous-half max and the layer_end window slices are contiguous.
    # TODO(synk): for large N/W, build these overlapping windows in-kernel from
    # the padded input (~8x less HBM read traffic, matters first on v5e).
    xp = jnp.pad(x[:, 0], ((0, 0), (0, 0), (56, 56)))                   # (N, 8, W+112)
    idx = (jnp.arange(Wout) * 16)[:, None] + jnp.arange(128)[None, :]   # (Wout, 128)
    Pm = xp[:, :, idx].transpose(0, 2, 1, 3).reshape(N, Wout, 8 * 128)  # (N, Wout, 1024)
    Pm = Pm.reshape(N, Wp, 2, 8 * 128).transpose(2, 1, 0, 3)            # (parity, wpool, n, 1024)
    P = Pm.reshape(2 * Wp * N, 8 * 128).astype(jnp.bfloat16)

    Y, feat = fused_forward_block(P, prep, n_batch=N, w_pool=Wp)

    # Un-permute output 1: rows (parity, wpool, n) -> w = 2*wpool + parity,
    # lane groups [g0,g2,g1,g3] -> original concat-H order (tiny XLA reshape).
    Yr = Y.reshape(2, Wp, N, 4, oc)
    omf = Yr.transpose(2, 4, 3, 1, 0).reshape(N, oc, 4, Wout)
    omf = omf[:, :, jnp.array(GROUP_PERM), :]                     # (N, oc, 4, Wout)

    out_features = feat[:, :, None, None]                         # (N, 128, 1, 1)
    return omf, out_features


# ----------------------------- pure-JAX reference ----------------------------

def reference_forward(x, p):
    def conv(xx, W, b, stride, pad):
        return lax.conv_general_dilated(
            xx, W, window_strides=stride, padding=pad,
            dimension_numbers=("NCHW", "OIHW", "NCHW"),
            precision=lax.Precision.HIGHEST) + b.reshape(1, -1, 1, 1)

    o1 = conv(x, p["W1"], p["b1"], (1, 16), [(0, 0), (0, 0)])
    o2 = conv(x, p["W2"], p["b2"], (1, 16), [(0, 0), (8, 8)])
    o3 = conv(x, p["W3"], p["b3"], (1, 16), [(0, 0), (24, 24)])
    o4 = conv(x, p["W4"], p["b4"], (1, 16), [(0, 0), (56, 56)])
    out = jnp.concatenate([o1, o2, o3, o4], axis=2)
    out = conv(out, p["W0"], p["b0"], (1, 1), [(0, 0), (0, 0)])
    omf = jnp.maximum(out, 0.0)
    pooled = lax.reduce_window(omf, -jnp.inf, lax.max, (1, 1, 2, 2), (1, 1, 2, 2), "VALID")
    f = jnp.maximum(conv(pooled, p["We1"], p["be1"], (3, 3), [(0, 0), (0, 0)]), 0.0)
    f = jnp.maximum(conv(f, p["We2"], p["be2"], (1, 1), [(0, 0), (0, 0)]), 0.0)
    return omf, f


# ----------------------------- main -------------------------------------------

if __name__ == "__main__":
    key = jax.random.PRNGKey(0)
    kx, kp = jax.random.split(key)

    # x: (batch=2, in_channels=1, H=8, W=512) -> branch outputs (2,32,1,32),
    # concat -> (2,32,4,32); layer_end -> (2,128,1,1).
    N, Cin, H, W = 2, 1, 8, 512
    x = jax.random.normal(kx, (N, Cin, H, W), jnp.float32)
    params = init_params(kp, in_channels=Cin, oc=32)

    prep = prepare_params(params)                 # runs once, off the hot path
    forward = jax.jit(multi_features_forward)

    out_multi_features, out_features = forward(x, prep)
    jax.block_until_ready((out_multi_features, out_features))

    assert out_multi_features.shape == (N, 32, 4, 32)
    assert out_features.shape == (N, 128, 1, 1)

    omf_expected, feat_expected = reference_forward(x, params)
    assert jnp.allclose(out_multi_features, omf_expected, rtol=2e-2, atol=2e-2)
    assert jnp.allclose(out_features, feat_expected, rtol=2e-2, atol=2e-2)

    print("KERNEL_OK")
</pallas_src>

<mosaic_0001>
module attributes {stable_mosaic.version = 11 : i64} {
  func.func @_fused_forward_kernel(%arg0: memref<64x1024xbf16, #tpu.memory_space<vmem>>, %arg1: memref<1024x128xbf16, #tpu.memory_space<vmem>>, %arg2: memref<1x128xf32, #tpu.memory_space<vmem>>, %arg3: memref<16x128x128xf32, #tpu.memory_space<vmem>>, %arg4: memref<1x128xf32, #tpu.memory_space<vmem>>, %arg5: memref<128x128xf32, #tpu.memory_space<vmem>>, %arg6: memref<1x128xf32, #tpu.memory_space<vmem>>, %arg7: memref<64x128xf32, #tpu.memory_space<vmem>>, %arg8: memref<2x128xf32, #tpu.memory_space<vmem>>, %arg9: memref<32x128xf32, #tpu.memory_space<vmem>>) attributes {dimension_semantics = [], scalar_prefetch = 0 : i64, scratch_operands = 1 : i64, tpu.core_type = #tpu.core_type<tc>} {
    %c0 = arith.constant 0 : index
    %c0_0 = arith.constant 0 : index
    %0 = vector.load %arg0[%c0, %c0_0] : memref<64x1024xbf16, #tpu.memory_space<vmem>>, vector<64x1024xbf16>
    %c0_1 = arith.constant 0 : index
    %c0_2 = arith.constant 0 : index
    %1 = vector.load %arg1[%c0_1, %c0_2] : memref<1024x128xbf16, #tpu.memory_space<vmem>>, vector<1024x128xbf16>
    %cst = arith.constant dense<0.000000e+00> : vector<64x128xf32>
    %2 = tpu.matmul %0, %1, %cst {dimension_numbers = #tpu.dot_dimension_numbers<[1], [0], [0], [1], [0, 0, 1, 1], [], []>} : vector<64x1024xbf16>, vector<1024x128xbf16>, vector<64x128xf32> -> vector<64x128xf32>
    %c0_3 = arith.constant 0 : index
    %c0_4 = arith.constant 0 : index
    %3 = vector.load %arg2[%c0_3, %c0_4] : memref<1x128xf32, #tpu.memory_space<vmem>>, vector<1x128xf32>
    %4 = vector.broadcast %3 : vector<1x128xf32> to vector<64x128xf32>
    %5 = arith.addf %2, %4 : vector<64x128xf32>
    %cst_5 = arith.constant 0.000000e+00 : f32
    %6 = vector.broadcast %cst_5 : f32 to vector<64x128xf32>
    %7 = arith.maximumf %5, %6 : vector<64x128xf32>
    %c0_6 = arith.constant 0 : index
    %c0_7 = arith.constant 0 : index
    %8 = vector.load %arg7[%c0_6, %c0_7] : memref<64x128xf32, #tpu.memory_space<vmem>>, vector<64x128xf32>
    tpu.vector_store %arg7[%c0_6, %c0_7], %7 {strides = array<i32>} : memref<64x128xf32, #tpu.memory_space<vmem>>, vector<64x128xf32>,
    %c64_i32 = arith.constant 64 : i32
    %9 = tpu.dynamic_rotate %7 by %c64_i32 dim 1 : vector<64x128xf32>, i32 -> vector<64x128xf32>
    %10 = arith.maximumf %7, %9 : vector<64x128xf32>
    %11 = vector.extract_strided_slice %10 {offsets = [0, 0], sizes = [32, 128], strides = [1, 1]} : vector<64x128xf32> to vector<32x128xf32>
    %12 = vector.extract_strided_slice %10 {offsets = [32, 0], sizes = [32, 128], strides = [1, 1]} : vector<64x128xf32> to vector<32x128xf32>
    %13 = arith.maximumf %11, %12 : vector<32x128xf32>
    %c0_8 = arith.constant 0 : index
    %c0_9 = arith.constant 0 : index
    %14 = vector.load %arg9[%c0_8, %c0_9] : memref<32x128xf32, #tpu.memory_space<vmem>>, vector<32x128xf32>
    tpu.vector_store %arg9[%c0_8, %c0_9], %13 {strides = array<i32>} : memref<32x128xf32, #tpu.memory_space<vmem>>, vector<32x128xf32>,
    %c0_10 = arith.constant 0 : index
    %c0_11 = arith.constant 0 : index
    %15 = vector.load %arg4[%c0_10, %c0_11] : memref<1x128xf32, #tpu.memory_space<vmem>>, vector<1x128xf32>
    %c0_12 = arith.constant 0 : index
    %c0_13 = arith.constant 0 : index
    %16 = vector.load %arg9[%c0_12, %c0_13] : memref<32x128xf32, #tpu.memory_space<vmem>>, vector<2x128xf32>
    %c0_14 = arith.constant 0 : index
    %c0_15 = arith.constant 0 : index
    %c0_16 = arith.constant 0 : index
    %17 = vector.load %arg3[%c0_14, %c0_15, %c0_16] : memref<16x128x128xf32, #tpu.memory_space<vmem>>, vector<1x128x128xf32>
    %18 = vector.shape_cast %17 : vector<1x128x128xf32> to vector<128x128xf32>
    %cst_17 = arith.constant dense<0.000000e+00> : vector<2x128xf32>
    %19 = tpu.matmul %16, %18, %cst_17 {dimension_numbers = #tpu.dot_dimension_numbers<[1], [0], [0], [1], [0, 0, 1, 1], [], []>} : vector<2x128xf32>, vector<128x128xf32>, vector<2x128xf32> -> vector<2x128xf32>
    %20 = vector.broadcast %15 : vector<1x128xf32> to vector<2x128xf32>
    %21 = arith.addf %20, %19 : vector<2x128xf32>
    %c2 = arith.constant 2 : index
    %c0_18 = arith.constant 0 : index
    %22 = vector.load %arg9[%c2, %c0_18] : memref<32x128xf32, #tpu.memory_space<vmem>>, vector<2x128xf32>
    %c1 = arith.constant 1 : index
    %c0_19 = arith.constant 0 : index
    %c0_20 = arith.constant 0 : index
    %23 = vector.load %arg3[%c1, %c0_19, %c0_20] : memref<16x128x128xf32, #tpu.memory_space<vmem>>, vector<1x128x128xf32>
    %24 = vector.shape_cast %23 : vector<1x128x128xf32> to vector<128x128xf32>
    %cst_21 = arith.constant dense<0.000000e+00> : vector<2x128xf32>
    %25 = tpu.matmul %22, %24, %cst_21 {dimension_numbers = #tpu.dot_dimension_numbers<[1], [0], [0], [1], [0, 0, 1, 1], [], []>} : vector<2x128xf32>, vector<128x128xf32>, vector<2x128xf32> -> vector<2x128xf32>
    %26 = arith.addf %21, %25 : vector<2x128xf32>
    %c4 = arith.constant 4 : index
    %c0_22 = arith.constant 0 : index
    %27 = vector.load %arg9[%c4, %c0_22] : memref<32x128xf32, #tpu.memory_space<vmem>>, vector<2x128xf32>
    %c2_23 = arith.constant 2 : index
    %c0_24 = arith.constant 0 : index
    %c0_25 = arith.constant 0 : index
    %28 = vector.load %arg3[%c2_23, %c0_24, %c0_25] : memref<16x128x128xf32, #tpu.memory_space<vmem>>, vector<1x128x128xf32>
    %29 = vector.shape_cast %28 : vector<1x128x128xf32> to vector<128x128xf32>
    %cst_26 = arith.constant dense<0.000000e+00> : vector<2x128xf32>
    %30 = tpu.matmul %27, %29, %cst_26 {dimension_numbers = #tpu.dot_dimension_numbers<[1], [0], [0], [1], [0, 0, 1, 1], [], []>} : vector<2x128xf32>, vector<128x128xf32>, vector<2x128xf32> -> vector<2x128xf32>
    %31 = arith.addf %26, %30 : vector<2x128xf32>
    %c6 = arith.constant 6 : index
    %c0_27 = arith.constant 0 : index
    %32 = vector.load %arg9[%c6, %c0_27] : memref<32x128xf32, #tpu.memory_space<vmem>>, vector<2x128xf32>
    %c3 = arith.constant 3 : index
    %c0_28 = arith.constant 0 : index
    %c0_29 = arith.constant 0 : index
    %33 = vector.load %arg3[%c3, %c0_28, %c0_29] : memref<16x128x128xf32, #tpu.memory_space<vmem>>, vector<1x128x128xf32>
    %34 = vector.shape_cast %33 : vector<1x128x128xf32> to vector<128x128xf32>
    %cst_30 = arith.constant dense<0.000000e+00> : vector<2x128xf32>
    %35 = tpu.matmul %32, %34, %cst_30 {dimension_numbers = #tpu.dot_dimension_numbers<[1], [0], [0], [1], [0, 0, 1, 1], [], []>} : vector<2x128xf32>, vector<128x128xf32>, vector<2x128xf32> -> vector<2x128xf32>
    %36 = arith.addf %31, %35 : vector<2x128xf32>
    %c8 = arith.constant 8 : index
    %c0_31 = arith.constant 0 : index
    %37 = vector.load %arg9[%c8, %c0_31] : memref<32x128xf32, #tpu.memory_space<vmem>>, vector<2x128xf32>
    %c4_32 = arith.constant 4 : index
    %c0_33 = arith.constant 0 : index
    %c0_34 = arith.constant 0 : index
    %38 = vector.load %arg3[%c4_32, %c0_33, %c0_34] : memref<16x128x128xf32, #tpu.memory_space<vmem>>, vector<1x128x128xf32>
    %39 = vector.shape_cast %38 : vector<1x128x128xf32> to vector<128x128xf32>
    %cst_35 = arith.constant dense<0.000000e+00> : vector<2x128xf32>
    %40 = tpu.matmul %37, %39, %cst_35 {dimension_numbers = #tpu.dot_dimension_numbers<[1], [0], [0], [1], [0, 0, 1, 1], [], []>} : vector<2x128xf32>, vector<128x128xf32>, vector<2x128xf32> -> vector<2x128xf32>
    %41 = arith.addf %36, %40 : vector<2x128xf32>
    %c10 = arith.constant 10 : index
    %c0_36 = arith.constant 0 : index
    %42 = vector.load %arg9[%c10, %c0_36] : memref<32x128xf32, #tpu.memory_space<vmem>>, vector<2x128xf32>
    %c5 = arith.constant 5 : index
    %c0_37 = arith.constant 0 : index
    %c0_38 = arith.constant 0 : index
    %43 = vector.load %arg3[%c5, %c0_37, %c0_38] : memref<16x128x128xf32, #tpu.memory_space<vmem>>, vector<1x128x128xf32>
    %44 = vector.shape_cast %43 : vector<1x128x128xf32> to vector<128x128xf32>
    %cst_39 = arith.constant dense<0.000000e+00> : vector<2x128xf32>
    %45 = tpu.matmul %42, %44, %cst_39 {dimension_numbers = #tpu.dot_dimension_numbers<[1], [0], [0], [1], [0, 0, 1, 1], [], []>} : vector<2x128xf32>, vector<128x128xf32>, vector<2x128xf32> -> vector<2x128xf32>
    %46 = arith.addf %41, %45 : vector<2x128xf32>
    %c12 = arith.constant 12 : index
    %c0_40 = arith.constant 0 : index
    %47 = vector.load %arg9[%c12, %c0_40] : memref<32x128xf32, #tpu.memory_space<vmem>>, vector<2x128xf32>
    %c6_41 = arith.constant 6 : index
    %c0_42 = arith.constant 0 : index
    %c0_43 = arith.constant 0 : index
    %48 = vector.load %arg3[%c6_41, %c0_42, %c0_43] : memref<16x128x128xf32, #tpu.memory_space<vmem>>, vector<1x128x128xf32>
    %49 = vector.shape_cast %48 : vector<1x128x128xf32> to vector<128x128xf32>
    %cst_44 = arith.constant dense<0.000000e+00> : vector<2x128xf32>
    %50 = tpu.matmul %47, %49, %cst_44 {dimension_numbers = #tpu.dot_dimension_numbers<[1], [0], [0], [1], [0, 0, 1, 1], [], []>} : vector<2x128xf32>, vector<128x128xf32>, vector<2x128xf32> -> vector<2x128xf32>
    %51 = arith.addf %46, %50 : vector<2x128xf32>
    %c14 = arith.constant 14 : index
    %c0_45 = arith.constant 0 : index
    %52 = vector.load %arg9[%c14, %c0_45] : memref<32x128xf32, #tpu.memory_space<vmem>>, vector<2x128xf32>
    %c7 = arith.constant 7 : index
    %c0_46 = arith.constant 0 : index
    %c0_47 = arith.constant 0 : index
    %53 = vector.load %arg3[%c7, %c0_46, %c0_47] : memref<16x128x128xf32, #tpu.memory_space<vmem>>, vector<1x128x128xf32>
    %54 = vector.shape_cast %53 : vector<1x128x128xf32> to vector<128x128xf32>
    %cst_48 = arith.constant dense<0.000000e+00> : vector<2x128xf32>
    %55 = tpu.matmul %52, %54, %cst_48 {dimension_numbers = #tpu.dot_dimension_numbers<[1], [0], [0], [1], [0, 0, 1, 1], [], []>} : vector<2x128xf32>, vector<128x128xf32>, vector<2x128xf32> -> vector<2x128xf32>
    %56 = arith.addf %51, %55 : vector<2x128xf32>
    %c16 = arith.constant 16 : index
    %c0_49 = arith.constant 0 : index
    %57 = vector.load %arg9[%c16, %c0_49] : memref<32x128xf32, #tpu.memory_space<vmem>>, vector<2x128xf32>
    %c8_50 = arith.constant 8 : index
    %c0_51 = arith.constant 0 : index
    %c0_52 = arith.constant 0 : index
    %58 = vector.load %arg3[%c8_50, %c0_51, %c0_52] : memref<16x128x128xf32, #tpu.memory_space<vmem>>, vector<1x128x128xf32>
    %59 = vector.shape_cast %58 : vector<1x128x128xf32> to vector<128x128xf32>
    %cst_53 = arith.constant dense<0.000000e+00> : vector<2x128xf32>
    %60 = tpu.matmul %57, %59, %cst_53 {dimension_numbers = #tpu.dot_dimension_numbers<[1], [0], [0], [1], [0, 0, 1, 1], [], []>} : vector<2x128xf32>, vector<128x128xf32>, vector<2x128xf32> -> vector<2x128xf32>
    %61 = arith.addf %56, %60 : vector<2x128xf32>
    %c18 = arith.constant 18 : index
    %c0_54 = arith.constant 0 : index
    %62 = vector.load %arg9[%c18, %c0_54] : memref<32x128xf32, #tpu.memory_space<vmem>>, vector<2x128xf32>
    %c9 = arith.constant 9 : index
    %c0_55 = arith.constant 0 : index
    %c0_56 = arith.constant 0 : index
    %63 = vector.load %arg3[%c9, %c0_55, %c0_56] : memref<16x128x128xf32, #tpu.memory_space<vmem>>, vector<1x128x128xf32>
    %64 = vector.shape_cast %63 : vector<1x128x128xf32> to vector<128x128xf32>
    %cst_57 = arith.constant dense<0.000000e+00> : vector<2x128xf32>
    %65 = tpu.matmul %62, %64, %cst_57 {dimension_numbers = #tpu.dot_dimension_numbers<[1], [0], [0], [1], [0, 0, 1, 1], [], []>} : vector<2x128xf32>, vector<128x128xf32>, vector<2x128xf32> -> vector<2x128xf32>
    %66 = arith.addf %61, %65 : vector<2x128xf32>
    %c20 = arith.constant 20 : index
    %c0_58 = arith.constant 0 : index
    %67 = vector.load %arg9[%c20, %c0_58] : memref<32x128xf32, #tpu.memory_space<vmem>>, vector<2x128xf32>
    %c10_59 = arith.constant 10 : index
    %c0_60 = arith.constant 0 : index
    %c0_61 = arith.constant 0 : index
    %68 = vector.load %arg3[%c10_59, %c0_60, %c0_61] : memref<16x128x128xf32, #tpu.memory_space<vmem>>, vector<1x128x128xf32>
    %69 = vector.shape_cast %68 : vector<1x128x128xf32> to vector<128x128xf32>
    %cst_62 = arith.constant dense<0.000000e+00> : vector<2x128xf32>
    %70 = tpu.matmul %67, %69, %cst_62 {dimension_numbers = #tpu.dot_dimension_numbers<[1], [0], [0], [1], [0, 0, 1, 1], [], []>} : vector<2x128xf32>, vector<128x128xf32>, vector<2x128xf32> -> vector<2x128xf32>
    %71 = arith.addf %66, %70 : vector<2x128xf32>
    %c22 = arith.constant 22 : index
    %c0_63 = arith.constant 0 : index
    %72 = vector.load %arg9[%c22, %c0_63] : memref<32x128xf32, #tpu.memory_space<vmem>>, vector<2x128xf32>
    %c11 = arith.constant 11 : index
    %c0_64 = arith.constant 0 : index
    %c0_65 = arith.constant 0 : index
    %73 = vector.load %arg3[%c11, %c0_64, %c0_65] : memref<16x128x128xf32, #tpu.memory_space<vmem>>, vector<1x128x128xf32>
    %74 = vector.shape_cast %73 : vector<1x128x128xf32> to vector<128x128xf32>
    %cst_66 = arith.constant dense<0.000000e+00> : vector<2x128xf32>
    %75 = tpu.matmul %72, %74, %cst_66 {dimension_numbers = #tpu.dot_dimension_numbers<[1], [0], [0], [1], [0, 0, 1, 1], [], []>} : vector<2x128xf32>, vector<128x128xf32>, vector<2x128xf32> -> vector<2x128xf32>
    %76 = arith.addf %71, %75 : vector<2x128xf32>
    %c24 = arith.constant 24 : index
    %c0_67 = arith.constant 0 : index
    %77 = vector.load %arg9[%c24, %c0_67] : memref<32x128xf32, #tpu.memory_space<vmem>>, vector<2x128xf32>
    %c12_68 = arith.constant 12 : index
    %c0_69 = arith.constant 0 : index
    %c0_70 = arith.constant 0 : index
    %78 = vector.load %arg3[%c12_68, %c0_69, %c0_70] : memref<16x128x128xf32, #tpu.memory_space<vmem>>, vector<1x128x128xf32>
    %79 = vector.shape_cast %78 : vector<1x128x128xf32> to vector<128x128xf32>
    %cst_71 = arith.constant dense<0.000000e+00> : vector<2x128xf32>
    %80 = tpu.matmul %77, %79, %cst_71 {dimension_numbers = #tpu.dot_dimension_numbers<[1], [0], [0], [1], [0, 0, 1, 1], [], []>} : vector<2x128xf32>, vector<128x128xf32>, vector<2x128xf32> -> vector<2x128xf32>
    %81 = arith.addf %76, %80 : vector<2x128xf32>
    %c26 = arith.constant 26 : index
    %c0_72 = arith.constant 0 : index
    %82 = vector.load %arg9[%c26, %c0_72] : memref<32x128xf32, #tpu.memory_space<vmem>>, vector<2x128xf32>
    %c13 = arith.constant 13 : index
    %c0_73 = arith.constant 0 : index
    %c0_74 = arith.constant 0 : index
    %83 = vector.load %arg3[%c13, %c0_73, %c0_74] : memref<16x128x128xf32, #tpu.memory_space<vmem>>, vector<1x128x128xf32>
    %84 = vector.shape_cast %83 : vector<1x128x128xf32> to vector<128x128xf32>
    %cst_75 = arith.constant dense<0.000000e+00> : vector<2x128xf32>
    %85 = tpu.matmul %82, %84, %cst_75 {dimension_numbers = #tpu.dot_dimension_numbers<[1], [0], [0], [1], [0, 0, 1, 1], [], []>} : vector<2x128xf32>, vector<128x128xf32>, vector<2x128xf32> -> vector<2x128xf32>
    %86 = arith.addf %81, %85 : vector<2x128xf32>
    %c28 = arith.constant 28 : index
    %c0_76 = arith.constant 0 : index
    %87 = vector.load %arg9[%c28, %c0_76] : memref<32x128xf32, #tpu.memory_space<vmem>>, vector<2x128xf32>
    %c14_77 = arith.constant 14 : index
    %c0_78 = arith.constant 0 : index
    %c0_79 = arith.constant 0 : index
    %88 = vector.load %arg3[%c14_77, %c0_78, %c0_79] : memref<16x128x128xf32, #tpu.memory_space<vmem>>, vector<1x128x128xf32>
    %89 = vector.shape_cast %88 : vector<1x128x128xf32> to vector<128x128xf32>
    %cst_80 = arith.constant dense<0.000000e+00> : vector<2x128xf32>
    %90 = tpu.matmul %87, %89, %cst_80 {dimension_numbers = #tpu.dot_dimension_numbers<[1], [0], [0], [1], [0, 0, 1, 1], [], []>} : vector<2x128xf32>, vector<128x128xf32>, vector<2x128xf32> -> vector<2x128xf32>
    %91 = arith.addf %86, %90 : vector<2x128xf32>
    %c30 = arith.constant 30 : index
    %c0_81 = arith.constant 0 : index
    %92 = vector.load %arg9[%c30, %c0_81] : memref<32x128xf32, #tpu.memory_space<vmem>>, vector<2x128xf32>
    %c15 = arith.constant 15 : index
    %c0_82 = arith.constant 0 : index
    %c0_83 = arith.constant 0 : index
    %93 = vector.load %arg3[%c15, %c0_82, %c0_83] : memref<16x128x128xf32, #tpu.memory_space<vmem>>, vector<1x128x128xf32>
    %94 = vector.shape_cast %93 : vector<1x128x128xf32> to vector<128x128xf32>
    %cst_84 = arith.constant dense<0.000000e+00> : vector<2x128xf32>
    %95 = tpu.matmul %92, %94, %cst_84 {dimension_numbers = #tpu.dot_dimension_numbers<[1], [0], [0], [1], [0, 0, 1, 1], [], []>} : vector<2x128xf32>, vector<128x128xf32>, vector<2x128xf32> -> vector<2x128xf32>
    %96 = arith.addf %91, %95 : vector<2x128xf32>
    %cst_85 = arith.constant 0.000000e+00 : f32
    %97 = vector.broadcast %cst_85 : f32 to vector<2x128xf32>
    %98 = arith.maximumf %96, %97 : vector<2x128xf32>
    %c0_86 = arith.constant 0 : index
    %c0_87 = arith.constant 0 : index
    %99 = vector.load %arg5[%c0_86, %c0_87] : memref<128x128xf32, #tpu.memory_space<vmem>>, vector<128x128xf32>
    %cst_88 = arith.constant dense<0.000000e+00> : vector<2x128xf32>
    %100 = tpu.matmul %98, %99, %cst_88 {dimension_numbers = #tpu.dot_dimension_numbers<[1], [0], [0], [1], [0, 0, 1, 1], [], []>} : vector<2x128xf32>, vector<128x128xf32>, vector<2x128xf32> -> vector<2x128xf32>
    %c0_89 = arith.constant 0 : index
    %c0_90 = arith.constant 0 : index
    %101 = vector.load %arg6[%c0_89, %c0_90] : memref<1x128xf32, #tpu.memory_space<vmem>>, vector<1x128xf32>
    %102 = vector.broadcast %101 : vector<1x128xf32> to vector<2x128xf32>
    %103 = arith.addf %100, %102 : vector<2x128xf32>
    %cst_91 = arith.constant 0.000000e+00 : f32
    %104 = vector.broadcast %cst_91 : f32 to vector<2x128xf32>
    %105 = arith.maximumf %103, %104 : vector<2x128xf32>
    %c0_92 = arith.constant 0 : index
    %c0_93 = arith.constant 0 : index
    %106 = vector.load %arg8[%c0_92, %c0_93] : memref<2x128xf32, #tpu.memory_space<vmem>>, vector<2x128xf32>
    tpu.vector_store %arg8[%c0_92, %c0_93], %105 {strides = array<i32>} : memref<2x128xf32, #tpu.memory_space<vmem>>, vector<2x128xf32>,
    return
  }
}

</mosaic_0001>

<bundles_post_ra>
// kernel: multi_features_forward.1
= control target key start
LH: loop header
LB: loop body
LE: loop exit
PB: predicated region body
PF: predicated region fallthrough
CT: control target
= control target key end

     0   :  { %s3844_s0 = inlined_call_operand.vmem [shape: bf16[64,1024], index: 0, kind: input, shape index: {}]   ;;  %s3845_s1 = inlined_call_operand.vmem [shape: bf16[1024,128], index: 1, kind: input, shape index: {}]   ;;  %s3846_s2 = inlined_call_operand.vmem [shape: f32[1,128], index: 2, kind: input, shape index: {}]   ;;  %s3847_s3 = inlined_call_operand.vmem [shape: f32[16,128,128], index: 3, kind: input, shape index: {}]   ;;  %s3848_s4 = inlined_call_operand.vmem [shape: f32[1,128], index: 4, kind: input, shape index: {}]   ;;  %s3849_s5 = inlined_call_operand.vmem [shape: f32[128,128], index: 5, kind: input, shape index: {}]   ;;  %s3850_s6 = inlined_call_operand.vmem [shape: f32[1,128], index: 6, kind: input, shape index: {}]   ;;  %s3851_s7 = inlined_call_operand.vmem [shape: f32[64,128], index: 7, kind: output, shape index: {0}]   ;;  %s3852_s8 = inlined_call_operand.hbm [shape: f32[2,128], index: 8, kind: output, shape index: {1}]  }
   0x1   :  { %v2370_v0 = vld [vmem:[%s3845_s1 + $0x38] sm:$0xff]  ;;  %v2369_v4 = vld [vmem:[%s3845_s1 + $0x30] sm:$0xff]  ;;  %v2368_v8 = vld [vmem:[%s3845_s1 + $0x28] sm:$0xff] }
   0x2   :  { %v2378_v1 = vld [vmem:[%s3845_s1 + $0x78] sm:$0xff]  ;;  %737 = vmatpush.bf16.msra.mxu0 %v2370_v0  ;;  %v2377_v5 = vld [vmem:[%s3845_s1 + $0x70] sm:$0xff]  ;;  %v2376_v9 = vld [vmem:[%s3845_s1 + $0x68] sm:$0xff] }
   0x3   :  { %v2386_v2 = vld [vmem:[%s3845_s1 + $0xb8] sm:$0xff]  ;;  %766 = vmatpush.bf16.msra.mxu1 %v2378_v1  ;;  %v2385_v6 = vld [vmem:[%s3845_s1 + $0xb0] sm:$0xff]  ;;  %v2384_v10 = vld [vmem:[%s3845_s1 + $0xa8] sm:$0xff] }
   0x4   :  { %v2394_v3 = vld [vmem:[%s3845_s1 + $0xf8] sm:$0xff]  ;;  %795 = vmatpush.bf16.msra.mxu2 %v2386_v2  ;;  %v2393_v7 = vld [vmem:[%s3845_s1 + $0xf0] sm:$0xff]  ;;  %v2392_v11 = vld [vmem:[%s3845_s1 + $0xe8] sm:$0xff] }
   0x5   :  { %824 = vmatpush.bf16.msra.mxu3 %v2394_v3  ;;  %v2367_v12 = vld [vmem:[%s3845_s1 + $0x20] sm:$0xff]  ;;  %v2366_v16 = vld [vmem:[%s3845_s1 + $0x18] sm:$0xff] }
   0x6   :  { %738 = vmatpush.bf16.msra.mxu0 %v2369_v4  ;;  %v2375_v13 = vld [vmem:[%s3845_s1 + $0x60] sm:$0xff]  ;;  %v2374_v17 = vld [vmem:[%s3845_s1 + $0x58] sm:$0xff] }
   0x7   :  { %767 = vmatpush.bf16.msra.mxu1 %v2377_v5  ;;  %v2383_v14 = vld [vmem:[%s3845_s1 + $0xa0] sm:$0xff]  ;;  %v2382_v18 = vld [vmem:[%s3845_s1 + $0x98] sm:$0xff] }
   0x8   :  { %796 = vmatpush.bf16.msra.mxu2 %v2385_v6  ;;  %v2391_v15 = vld [vmem:[%s3845_s1 + $0xe0] sm:$0xff]  ;;  %v2390_v19 = vld [vmem:[%s3845_s1 + $0xd8] sm:$0xff] }
   0x9   :  { %825 = vmatpush.bf16.msra.mxu3 %v2393_v7 }
   0xa   :  { %739 = vmatpush.bf16.msra.mxu0 %v2368_v8 }
   0xb   :  { %768 = vmatpush.bf16.msra.mxu1 %v2376_v9 }
   0xc   :  { %797 = vmatpush.bf16.msra.mxu2 %v2384_v10 }
   0xd   :  { %826 = vmatpush.bf16.msra.mxu3 %v2392_v11 }
   0xe   :  { %740 = vmatpush.bf16.msra.mxu0 %v2367_v12 }
   0xf   :  { %769 = vmatpush.bf16.msra.mxu1 %v2375_v13 }
  0x10   :  { %798 = vmatpush.bf16.msra.mxu2 %v2383_v14 }
  0x11   :  { %827 = vmatpush.bf16.msra.mxu3 %v2391_v15 }
  0x12   :  { %14 = vsyncpa [#allocation4], 0  ;;  %741 = vmatpush.bf16.msra.mxu0 %v2366_v16  ;;  %v2365_v20 = vld [vmem:[%s3845_s1 + $0x10] sm:$0xff]  ;;  %v2364_v24 = vld [vmem:[%s3845_s1 + $0x8] sm:$0xff]  ;;  %s2458_s17 = smov 64   ;;  %s2459_s9 = smov [#allocation3]  }
  0x13   :  { %770 = vmatpush.bf16.msra.mxu1 %v2374_v17  ;;  %v2373_v21 = vld [vmem:[%s3845_s1 + $0x50] sm:$0xff]  ;;  %v2372_v25 = vld [vmem:[%s3845_s1 + $0x48] sm:$0xff]  ;;  %v2363_v28 = vld [vmem:[%s3845_s1] sm:$0xff]  ;;  %s1694_s10 = sshll.u32 %s2459_s9, 4  ;;  %s1696_s13 = sshll.u32 %s3852_s8, 4  ;;  %s1695_s10 = int_to_ptr.vmem [resolvable:$true] %s1694_s10  ;;  %s1697_s13 = int_to_ptr.hbm [resolvable:$true] %s1696_s13 }
  0x14   :  { %799 = vmatpush.bf16.msra.mxu2 %v2382_v18  ;;  %v2381_v22 = vld [vmem:[%s3845_s1 + $0x90] sm:$0xff]  ;;  %v2380_v26 = vld [vmem:[%s3845_s1 + $0x88] sm:$0xff]  ;;  %v2371_v29 = vld [vmem:[%s3845_s1 + $0x40] sm:$0xff] }
  0x15   :  { %828 = vmatpush.bf16.msra.mxu3 %v2390_v19  ;;  %v2389_v23 = vld [vmem:[%s3845_s1 + $0xd0] sm:$0xff]  ;;  %v2388_v27 = vld [vmem:[%s3845_s1 + $0xc8] sm:$0xff]  ;;  %v2379_v30 = vld [vmem:[%s3845_s1 + $0x80] sm:$0xff] }
  0x16   :  { %742 = vmatpush.bf16.msra.mxu0 %v2365_v20  ;;  %v2387_v31 = vld [vmem:[%s3845_s1 + $0xc0] sm:$0xff]  ;;  %v1717_v36 = vld [vmem:[%s3844_s0 + $0x8] sm:$0xf]  ;;  %v2332_v38 = vld [vmem:[%s3844_s0 + $0xc] sm:$0xf] }
  0x17   :  { %771 = vmatpush.bf16.msra.mxu1 %v2373_v21  ;;  %v1709_v32 = vld [vmem:[%s3844_s0] sm:$0xf]  ;;  %v2331_v34 = vld [vmem:[%s3844_s0 + $0x4] sm:$0xf]  ;;  %v2336_v37 = vld [vmem:[%s3844_s0 + $0x24] sm:$0xf0] }
  0x18   :  { %800 = vmatpush.bf16.msra.mxu2 %v2381_v22  ;;  %v2335_v33 = vld [vmem:[%s3844_s0 + $0x1c] sm:$0xf0]  ;;  %v1711_v35 = vld [vmem:[%s3844_s0 + $0x20] sm:$0xf0]  ;;  %v1719_v39 = vld [vmem:[%s3844_s0 + $0x28] sm:$0xf0]  ;;  %v1718_v44 = vor.u32 %v2336_v37, %v1717_v36 }
  0x19   :  { %829 = vmatpush.bf16.msra.mxu3 %v2389_v23  ;;  %v2418_v40 = vld [vmem:[%s3845_s1 + $0x1b8] sm:$0xff]  ;;  %v1710_v42 = vor.u32 %v2335_v33, %v1709_v32  ;;  %v1714_v43 = vor.u32 %v2331_v34, %v1711_v35  ;;  %v1722_v45 = vor.u32 %v2332_v38, %v1719_v39  ;;  %v2417_v48 = vld [vmem:[%s3845_s1 + $0x1b0] sm:$0xff]  ;;  %v2416_v52 = vld [vmem:[%s3845_s1 + $0x1a8] sm:$0xff] }
  0x1a   :  { %743 = vmatpush.bf16.msra.mxu0 %v2364_v24  ;;  %v2402_v41 = vld [vmem:[%s3845_s1 + $0x138] sm:$0xff]  ;;  %v2401_v49 = vld [vmem:[%s3845_s1 + $0x130] sm:$0xff]  ;;  %v2400_v53 = vld [vmem:[%s3845_s1 + $0x128] sm:$0xff] }
  0x1b   :  { %772 = vmatpush.bf16.msra.mxu1 %v2372_v25  ;;  %v2426_v46 = vld [vmem:[%s3845_s1 + $0x1f8] sm:$0xff]  ;;  %v2425_v50 = vld [vmem:[%s3845_s1 + $0x1f0] sm:$0xff]  ;;  %v2408_v54 = vld [vmem:[%s3845_s1 + $0x168] sm:$0xff] }
  0x1c   :  { %801 = vmatpush.bf16.msra.mxu2 %v2380_v26  ;;  %v2410_v47 = vld [vmem:[%s3845_s1 + $0x178] sm:$0xff]  ;;  %v2409_v51 = vld [vmem:[%s3845_s1 + $0x170] sm:$0xff]  ;;  %v2424_v55 = vld [vmem:[%s3845_s1 + $0x1e8] sm:$0xff] }
  0x1d   :  { %830 = vmatpush.bf16.msra.mxu3 %v2388_v27  ;;  %v1741_v56 = vld [vmem:[%s3844_s0 + $0x40] sm:$0xf]  ;;  %v2339_v60 = vld [vmem:[%s3844_s0 + $0x44] sm:$0xf]  ;;  %v1749_v62 = vld [vmem:[%s3844_s0 + $0x48] sm:$0xf] }
  0x1e   :  { %744 = vmatpush.bf16.msra.mxu0 %v2363_v28  ;;  %v2399_v57 = vld [vmem:[%s3845_s1 + $0x120] sm:$0xff]  ;;  %v2344_v63 = vld [vmem:[%s3844_s0 + $0x64] sm:$0xf0]  ;;  %v2340_v0 = vld [vmem:[%s3844_s0 + $0x4c] sm:$0xf] }
  0x1f   :  { %773 = vmatpush.bf16.msra.mxu1 %v2371_v29  ;;  %v2415_v58 = vld [vmem:[%s3845_s1 + $0x1a0] sm:$0xff]  ;;  %v1751_v1 = vld [vmem:[%s3844_s0 + $0x68] sm:$0xf0]  ;;  %v1750_v6 = vor.u32 %v2344_v63, %v1749_v62  ;;  %v2398_v8 = vld [vmem:[%s3845_s1 + $0x118] sm:$0xff] }
  0x20   :  { %802 = vmatpush.bf16.msra.mxu2 %v2379_v30  ;;  %v2343_v59 = vld [vmem:[%s3844_s0 + $0x5c] sm:$0xf0]  ;;  %v1743_v61 = vld [vmem:[%s3844_s0 + $0x60] sm:$0xf0]  ;;  %v1754_v7 = vor.u32 %v2340_v0, %v1751_v1  ;;  %v2406_v9 = vld [vmem:[%s3845_s1 + $0x158] sm:$0xff] }
  0x21   :  { %831 = vmatpush.bf16.msra.mxu3 %v2387_v31  ;;  %745 = vmatmul.bf16.vlgmr.msra.gmra.mxu0 %v1710_v42  ;;  %v2407_v2 = vld [vmem:[%s3845_s1 + $0x160] sm:$0xff]  ;;  %v1742_v4 = vor.u32 %v2343_v59, %v1741_v56  ;;  %v1746_v5 = vor.u32 %v2339_v60, %v1743_v61  ;;  %v2414_v10 = vld [vmem:[%s3845_s1 + $0x198] sm:$0xff]  ;;  %v2397_v12 = vld [vmem:[%s3845_s1 + $0x110] sm:$0xff] }
  0x22   :  { %853 = vmatpush.bf16.msrb.mxu0 %v2402_v41  ;;  %774 = vmatmul.bf16.vlgmr.msra.gmra.mxu1 %v1714_v43  ;;  %v2423_v3 = vld [vmem:[%s3845_s1 + $0x1e0] sm:$0xff]  ;;  %v2422_v11 = vld [vmem:[%s3845_s1 + $0x1d8] sm:$0xff]  ;;  %v2405_v13 = vld [vmem:[%s3845_s1 + $0x150] sm:$0xff] }
  0x23   :  { %803 = vmatmul.bf16.vlgmr.msra.gmra.mxu2 %v1718_v44  ;;  %882 = vmatpush.bf16.msrb.mxu1 %v2410_v47  ;;  %v2413_v14 = vld [vmem:[%s3845_s1 + $0x190] sm:$0xff]  ;;  %v2396_v16 = vld [vmem:[%s3845_s1 + $0x108] sm:$0xff]  ;;  %v1773_v18 = vld [vmem:[%s3844_s0 + $0x80] sm:$0xf] }
  0x24   :  { %911 = vmatpush.bf16.msrb.mxu2 %v2418_v40  ;;  %832 = vmatmul.bf16.vlgmr.msra.gmra.mxu3 %v1722_v45  ;;  %v2421_v15 = vld [vmem:[%s3845_s1 + $0x1d0] sm:$0xff]  ;;  %v2404_v17 = vld [vmem:[%s3845_s1 + $0x148] sm:$0xff]  ;;  %v2351_v21 = vld [vmem:[%s3844_s0 + $0x9c] sm:$0xf0] }
  0x25   :  { %940 = vmatpush.bf16.msrb.mxu3 %v2426_v46  ;;  %v2412_v19 = vld [vmem:[%s3845_s1 + $0x188] sm:$0xff]  ;;  %v2347_v22 = vld [vmem:[%s3844_s0 + $0x84] sm:$0xf]  ;;  %v1774_v32 = vor.u32 %v2351_v21, %v1773_v18  ;;  %v1805_v36 = vld [vmem:[%s3844_s0 + $0xc0] sm:$0xf] }
  0x26   :  { %854 = vmatpush.bf16.msrb.mxu0 %v2401_v49  ;;  %v2420_v20 = vld [vmem:[%s3845_s1 + $0x1c8] sm:$0xff]  ;;  %v1775_v23 = vld [vmem:[%s3844_s0 + $0xa0] sm:$0xf0]  ;;  %v2359_v37 = vld [vmem:[%s3844_s0 + $0xdc] sm:$0xf0] }
  0x27   :  { %883 = vmatpush.bf16.msrb.mxu1 %v2409_v51  ;;  %v1781_v24 = vld [vmem:[%s3844_s0 + $0x88] sm:$0xf]  ;;  %v2348_v26 = vld [vmem:[%s3844_s0 + $0x8c] sm:$0xf]  ;;  %v2395_v28 = vld [vmem:[%s3845_s1 + $0x100] sm:$0xff]  ;;  %v1778_v33 = vor.u32 %v2347_v22, %v1775_v23  ;;  %v1806_v44 = vor.u32 %v2359_v37, %v1805_v36 }
  0x28   :  { %912 = vmatpush.bf16.msrb.mxu2 %v2417_v48  ;;  %v2352_v25 = vld [vmem:[%s3844_s0 + $0xa4] sm:$0xf0]  ;;  %v1783_v27 = vld [vmem:[%s3844_s0 + $0xa8] sm:$0xf0]  ;;  %v2403_v29 = vld [vmem:[%s3845_s1 + $0x140] sm:$0xff] }
  0x29   :  { %941 = vmatpush.bf16.msrb.mxu3 %v2425_v50  ;;  %v2411_v30 = vld [vmem:[%s3845_s1 + $0x180] sm:$0xff]  ;;  %v1782_v34 = vor.u32 %v2352_v25, %v1781_v24  ;;  %v1786_v35 = vor.u32 %v2348_v26, %v1783_v27  ;;  %v1813_v40 = vld [vmem:[%s3844_s0 + $0xc8] sm:$0xf]  ;;  %v2356_v42 = vld [vmem:[%s3844_s0 + $0xcc] sm:$0xf] }
  0x2a   :  { %855 = vmatpush.bf16.msrb.mxu0 %v2400_v53  ;;  %v2419_v31 = vld [vmem:[%s3845_s1 + $0x1c0] sm:$0xff]  ;;  %v2360_v41 = vld [vmem:[%s3844_s0 + $0xe4] sm:$0xf0]  ;;  %v1815_v43 = vld [vmem:[%s3844_s0 + $0xe8] sm:$0xf0] }
  0x2b   :  { %884 = vmatpush.bf16.msrb.mxu1 %v2408_v54  ;;  %v2355_v38 = vld [vmem:[%s3844_s0 + $0xc4] sm:$0xf]  ;;  %v1814_v46 = vor.u32 %v2360_v41, %v1813_v40  ;;  %v1818_v47 = vor.u32 %v2356_v42, %v1815_v43  ;;  %v1725_v48 = vld [vmem:[%s3844_s0 + $0x10] sm:$0xf]  ;;  %v2333_v50 = vld [vmem:[%s3844_s0 + $0x14] sm:$0xf] }
  0x2c   :  { %913 = vmatpush.bf16.msrb.mxu2 %v2416_v52  ;;  %v1807_v39 = vld [vmem:[%s3844_s0 + $0xe0] sm:$0xf0]  ;;  %v2337_v49 = vld [vmem:[%s3844_s0 + $0x2c] sm:$0xf0]  ;;  %v1727_v51 = vld [vmem:[%s3844_s0 + $0x30] sm:$0xf0] }
  0x2d   :  { %942 = vmatpush.bf16.msrb.mxu3 %v2424_v55  ;;  %v1810_v45 = vor.u32 %v2355_v38, %v1807_v39  ;;  %v1733_v52 = vld [vmem:[%s3844_s0 + $0x18] sm:$0xf]  ;;  %v2334_v54 = vld [vmem:[%s3844_s0 + $0x1c] sm:$0xf]  ;;  %v1726_v56 = vor.u32 %v2337_v49, %v1725_v48  ;;  %v1757_v60 = vld [vmem:[%s3844_s0 + $0x50] sm:$0xf] }
  0x2e   :  { %856 = vmatpush.bf16.msrb.mxu0 %v2399_v57  ;;  %v2338_v53 = vld [vmem:[%s3844_s0 + $0x34] sm:$0xf0]  ;;  %v1735_v55 = vld [vmem:[%s3844_s0 + $0x38] sm:$0xf0]  ;;  %v1730_v57 = vor.u32 %v2333_v50, %v1727_v51  ;;  %v2345_v61 = vld [vmem:[%s3844_s0 + $0x6c] sm:$0xf0] }
  0x2f   :  { %885 = vmatpush.bf16.msrb.mxu1 %v2407_v2  ;;  %v1738_v59 = vor.u32 %v2334_v54, %v1735_v55  ;;  %v2341_v62 = vld [vmem:[%s3844_s0 + $0x54] sm:$0xf]  ;;  %v1765_v0 = vld [vmem:[%s3844_s0 + $0x58] sm:$0xf]  ;;  %v2342_v2 = vld [vmem:[%s3844_s0 + $0x5c] sm:$0xf] }
  0x30   :  { %914 = vmatpush.bf16.msrb.mxu2 %v2415_v58  ;;  %v1734_v58 = vor.u32 %v2338_v53, %v1733_v52  ;;  %v1759_v63 = vld [vmem:[%s3844_s0 + $0x70] sm:$0xf0]  ;;  %v2346_v1 = vld [vmem:[%s3844_s0 + $0x74] sm:$0xf0]  ;;  %v2361_v21 = vld [vmem:[%s3844_s0 + $0xec] sm:$0xf0] }
  0x31   :  { %943 = vmatpush.bf16.msrb.mxu3 %v2423_v3  ;;  %750 = vmatmul.bf16.gmra.mxu0 %v1742_v4  ;;  %v1767_v3 = vld [vmem:[%s3844_s0 + $0x78] sm:$0xf0]  ;;  %v1758_v4 = vor.u32 %v2345_v61, %v1757_v60  ;;  %v1829_v22 = vld [vmem:[%s3844_s0 + $0xd8] sm:$0xf]  ;;  %v2357_v23 = vld [vmem:[%s3844_s0 + $0xd4] sm:$0xf] }
  0x32   :  { %779 = vmatmul.bf16.gmra.mxu1 %v1746_v5  ;;  %857 = vmatpush.bf16.msrb.mxu0 %v2398_v8  ;;  %v1762_v5 = vor.u32 %v2341_v62, %v1759_v63  ;;  %v1789_v8 = vld [vmem:[%s3844_s0 + $0x90] sm:$0xf]  ;;  %v1823_v24 = vld [vmem:[%s3844_s0 + $0xf0] sm:$0xf0]  ;;  %v2362_v25 = vld [vmem:[%s3844_s0 + $0xf4] sm:$0xf0] }
  0x33   :  { %808 = vmatmul.bf16.gmra.mxu2 %v1750_v6  ;;  %886 = vmatpush.bf16.msrb.mxu1 %v2406_v9  ;;  %v1766_v6 = vor.u32 %v2346_v1, %v1765_v0  ;;  %v2353_v9 = vld [vmem:[%s3844_s0 + $0xac] sm:$0xf0]  ;;  %v2358_v26 = vld [vmem:[%s3844_s0 + $0xdc] sm:$0xf] }
  0x34   :  { %837 = vmatmul.bf16.gmra.mxu3 %v1754_v7  ;;  %915 = vmatpush.bf16.msrb.mxu2 %v2414_v10  ;;  %v1770_v7 = vor.u32 %v2342_v2, %v1767_v3  ;;  %v2349_v10 = vld [vmem:[%s3844_s0 + $0x94] sm:$0xf]  ;;  %v1831_v27 = vld [vmem:[%s3844_s0 + $0xf8] sm:$0xf0] }
  0x35   :  { %944 = vmatpush.bf16.msrb.mxu3 %v2422_v11  ;;  %v1791_v11 = vld [vmem:[%s3844_s0 + $0xb0] sm:$0xf0] }
  0x36   :  { %858 = vmatpush.bf16.msrb.mxu0 %v2397_v12  ;;  %v1797_v12 = vld [vmem:[%s3844_s0 + $0x98] sm:$0xf] }
  0x37   :  { %887 = vmatpush.bf16.msrb.mxu1 %v2405_v13  ;;  %v2354_v13 = vld [vmem:[%s3844_s0 + $0xb4] sm:$0xf0] }
  0x38   :  { %916 = vmatpush.bf16.msrb.mxu2 %v2413_v14  ;;  %v2350_v14 = vld [vmem:[%s3844_s0 + $0x9c] sm:$0xf]  ;;  %v1798_v18 = vor.u32 %v2354_v13, %v1797_v12 }
  0x39   :  { %945 = vmatpush.bf16.msrb.mxu3 %v2421_v15  ;;  %v1799_v15 = vld [vmem:[%s3844_s0 + $0xb8] sm:$0xf0] }
  0x3a   :  { %859 = vmatpush.bf16.msrb.mxu0 %v2396_v16  ;;  %v1790_v16 = vor.u32 %v2353_v9, %v1789_v8 }
  0x3b   :  { %888 = vmatpush.bf16.msrb.mxu1 %v2404_v17  ;;  %v1794_v17 = vor.u32 %v2349_v10, %v1791_v11 }
  0x3c   :  { %917 = vmatpush.bf16.msrb.mxu2 %v2412_v19  ;;  %v1802_v19 = vor.u32 %v2350_v14, %v1799_v15 }
  0x3d   :  { %946 = vmatpush.bf16.msrb.mxu3 %v2420_v20  ;;  %v1821_v20 = vld [vmem:[%s3844_s0 + $0xd0] sm:$0xf] }
  0x3e   :  { %860 = vmatpush.bf16.msrb.mxu0 %v2395_v28  ;;  %v1822_v28 = vor.u32 %v2361_v21, %v1821_v20 }
  0x3f   :  { %889 = vmatpush.bf16.msrb.mxu1 %v2403_v29  ;;  %v1826_v29 = vor.u32 %v2357_v23, %v1823_v24 }
  0x40   :  { %918 = vmatpush.bf16.msrb.mxu2 %v2411_v30  ;;  %v1830_v30 = vor.u32 %v2362_v25, %v1829_v22 }
  0x41   :  { %947 = vmatpush.bf16.msrb.mxu3 %v2419_v31  ;;  %755 = vmatmul.bf16.gmra.mxu0 %v1774_v32  ;;  %v1834_v31 = vor.u32 %v2358_v26, %v1831_v27 }
  0x42   :  { %784 = vmatmul.bf16.gmra.mxu1 %v1778_v33 }
  0x43   :  { %813 = vmatmul.bf16.gmra.mxu2 %v1782_v34 }
  0x44   :  { %842 = vmatmul.bf16.gmra.mxu3 %v1786_v35 }
  0x51   :  { %760 = vmatmul.bf16.gmra.mxu0 %v1806_v44 }
  0x52   :  { %789 = vmatmul.bf16.gmra.mxu1 %v1810_v45 }
  0x53   :  { %818 = vmatmul.bf16.gmra.mxu2 %v1814_v46 }
  0x54   :  { %847 = vmatmul.bf16.gmra.mxu3 %v1818_v47 }
  0x61   :  { %861 = vmatmul.bf16.vlgmr.msrb.gmra.mxu0 %v1726_v56  ;;  %v2906_v56 = vld [vmem:[%s3846_s2] ss:$0 sm:$0xff] }
  0x62   :  { %890 = vmatmul.bf16.vlgmr.msrb.gmra.mxu1 %v1730_v57 }
  0x63   :  { %919 = vmatmul.bf16.vlgmr.msrb.gmra.mxu2 %v1734_v58 }
  0x64   :  { %948 = vmatmul.bf16.vlgmr.msrb.gmra.mxu3 %v1738_v59 }
  0x71   :  { %866 = vmatmul.bf16.gmra.mxu0 %v1758_v4 }
  0x72   :  { %895 = vmatmul.bf16.gmra.mxu1 %v1762_v5 }
  0x73   :  { %924 = vmatmul.bf16.gmra.mxu2 %v1766_v6 }
  0x74   :  { %953 = vmatmul.bf16.gmra.mxu3 %v1770_v7 }
  0x81   :  { %871 = vmatmul.bf16.gmra.mxu0 %v1790_v16 }
  0x82   :  { %900 = vmatmul.bf16.gmra.mxu1 %v1794_v17 }
  0x83   :  { %929 = vmatmul.bf16.gmra.mxu2 %v1798_v18 }
  0x84   :  { %958 = vmatmul.bf16.gmra.mxu3 %v1802_v19 }
  0x91   :  { %876 = vmatmul.bf16.gmra.mxu0 %v1822_v28 }
  0x92   :  { %905 = vmatmul.bf16.gmra.mxu1 %v1826_v29 }
  0x93   :  { %934 = vmatmul.bf16.gmra.mxu2 %v1830_v30 }
  0x94   :  { %963 = vmatmul.bf16.gmra.mxu3 %v1834_v31 }
  0x9e   :  { %v746_v32 = vpop.f32.mrf.mxu0 }
  0x9f   :  { %v775_v33 = vpop.f32.mrf.mxu1  ;;  %v747_v59 = vadd.f32 %v2906_v56, %v746_v32 }
  0xa1   :  { %v776_v62 = vadd.f32 %v775_v33, %v747_v59 }
  0xa6   :  { %v804_v34 = vpop.f32.mrf.mxu2  ;;  %v748_v36 = vpop.f32.mrf.mxu0 }
  0xa7   :  { %v833_v35 = vpop.f32.mrf.mxu3  ;;  %v777_v37 = vpop.f32.mrf.mxu1  ;;  %v805_v1 = vadd.f32 %v804_v34, %v776_v62  ;;  %v749_v2 = vadd.f32 %v2906_v56, %v748_v36 }
  0xa9   :  { %v834_v5 = vadd.f32 %v833_v35, %v805_v1  ;;  %v778_v8 = vadd.f32 %v777_v37, %v749_v2 }
  0xae   :  { %v806_v38 = vpop.f32.mrf.mxu2  ;;  %v751_v40 = vpop.f32.mrf.mxu0 }
  0xaf   :  { %v835_v39 = vpop.f32.mrf.mxu3  ;;  %v780_v41 = vpop.f32.mrf.mxu1  ;;  %v807_v10 = vadd.f32 %v806_v38, %v778_v8  ;;  %v752_v11 = vadd.f32 %v2906_v56, %v751_v40 }
  0xb1   :  { %v836_v15 = vadd.f32 %v835_v39, %v807_v10  ;;  %v781_v16 = vadd.f32 %v780_v41, %v752_v11 }
  0xb6   :  { %v809_v42 = vpop.f32.mrf.mxu2  ;;  %v753_v44 = vpop.f32.mrf.mxu0 }
  0xb7   :  { %v838_v43 = vpop.f32.mrf.mxu3  ;;  %v782_v45 = vpop.f32.mrf.mxu1  ;;  %v810_v22 = vadd.f32 %v809_v42, %v781_v16  ;;  %v754_v24 = vadd.f32 %v2906_v56, %v753_v44  ;;  %v1033_v16 = vld [vmem:[%s3847_s3 + $0x70] sm:$0xff] }
  0xb9   :  { %v839_v28 = vadd.f32 %v838_v43, %v810_v22  ;;  %v783_v32 = vadd.f32 %v782_v45, %v754_v24  ;;  %v2121_v22 = vld [vmem:[%s3847_s3 + $0x170] sm:$0xff] }
  0xba   :  { %v2137_v24 = vld [vmem:[%s3847_s3 + $0x1f0] sm:$0xff] }
  0xbe   :  { %v811_v46 = vpop.f32.mrf.mxu2  ;;  %v756_v48 = vpop.f32.mrf.mxu0 }
  0xbf   :  { %v2889_v47 = vpop.f32.mrf.mxu3  ;;  %v785_v49 = vpop.f32.mrf.mxu1  ;;  %v812_v35 = vadd.f32 %v811_v46, %v783_v32  ;;  %v757_v36 = vadd.f32 %v2906_v56, %v756_v48  ;;  %v2119_v32 = vld [vmem:[%s3847_s3 + $0x160] sm:$0xff] }
  0xc1   :  { %v841_v41 = vadd.f32 %v2889_v47, %v812_v35  ;;  %v786_v42 = vadd.f32 %v785_v49, %v757_v36  ;;  %v2135_v35 = vld [vmem:[%s3847_s3 + $0x1e0] sm:$0xff]  ;;  %v1030_v36 = vld [vmem:[%s3847_s3 + $0x58] sm:$0xff] }
  0xc6   :  { %v2891_v50 = vpop.f32.mrf.mxu2  ;;  %v2895_v52 = vpop.f32.mrf.mxu0 }
  0xc7   :  { %v2893_v51 = vpop.f32.mrf.mxu3  ;;  %v2897_v53 = vpop.f32.mrf.mxu1  ;;  %v815_v59 = vadd.f32 %v2891_v50, %v786_v42  ;;  %v759_v1 = vadd.f32 %v2906_v56, %v2895_v52 }
  0xc9   :  { %v788_v8 = vadd.f32 %v2897_v53, %v759_v1  ;;  %v2106_v53 = vld [vmem:[%s3847_s3 + $0xf8] sm:$0xff] }
  0xca   :  { %1077 = vmatpush.msra.mxu1 %v2106_v53  ;;  %v2101_v53 = vld [vmem:[%s3847_s3 + $0xd0] sm:$0xff] }
  0xce   :  { %v2899_v54 = vpop.f32.mrf.mxu2  ;;  %v2908_v57 = vpop.f32.mrf.mxu0 }
  0xcf   :  { %v2901_v55 = vpop.f32.mrf.mxu3  ;;  %v2910_v58 = vpop.f32.mrf.mxu1  ;;  %v817_v10 = vadd.f32 %v2899_v54, %v788_v8  ;;  %v762_v11 = vadd.f32 %v2906_v56, %v2908_v57  ;;  %v2122_v54 = vld [vmem:[%s3847_s3 + $0x178] sm:$0xff] }
  0xd0   :  { %1116 = vmatpush.msra.mxu2 %v2122_v54  ;;  %v2117_v54 = vld [vmem:[%s3847_s3 + $0x150] sm:$0xff] }
  0xd2   :  { %1117 = vmatpush.msra.mxu2 %v2121_v22  ;;  %v1026_v22 = vld [vmem:[%s3847_s3 + $0x38] sm:$0xff] }
  0xd6   :  { %v2913_v60 = vpop.f32.mrf.mxu2  ;;  %v2917_v63 = vpop.f32.mrf.mxu0 }
  0xd7   :  { %v2915_v61 = vpop.f32.mrf.mxu3  ;;  %v2919_v0 = vpop.f32.mrf.mxu1 }
  0xde   :  { %v2922_v3 = vpop.f32.mrf.mxu2  ;;  %v862_v6 = vpop.f32.mrf.mxu0 }
  0xdf   :  { %v2924_v4 = vpop.f32.mrf.mxu3  ;;  %v891_v7 = vpop.f32.mrf.mxu1  ;;  %v863_v9 = vadd.f32 %v862_v6, %v834_v5  ;;  %v844_v5 = vadd.f32 %v2893_v51, %v815_v59 }
  0xe1   :  { %v892_v12 = vadd.f32 %v891_v7, %v863_v9 }
  0xe6   :  { %v920_v13 = vpop.f32.mrf.mxu2  ;;  %v864_v18 = vpop.f32.mrf.mxu0 }
  0xe7   :  { %v949_v14 = vpop.f32.mrf.mxu3  ;;  %v921_v17 = vadd.f32 %v920_v13, %v892_v12  ;;  %v893_v19 = vpop.f32.mrf.mxu1  ;;  %v865_v21 = vadd.f32 %v864_v18, %v836_v15  ;;  %v1034_v13 = vld [vmem:[%s3847_s3 + $0x78] sm:$0xff]  ;;  %v846_v18 = vadd.f32 %v2901_v55, %v817_v10  ;;  %v2104_v55 = vld [vmem:[%s3847_s3 + $0xe8] sm:$0xff] }
  0xe8   :  { %1035 = vmatpush.msra.mxu0 %v1034_v13  ;;  %v2138_v15 = vld [vmem:[%s3847_s3 + $0x1f8] sm:$0xff]  ;;  %v1029_v13 = vld [vmem:[%s3847_s3 + $0x50] sm:$0xff] }
  0xe9   :  { %v950_v20 = vadd.f32 %v949_v14, %v921_v17  ;;  %v894_v25 = vadd.f32 %v893_v19, %v865_v21  ;;  %v2105_v17 = vld [vmem:[%s3847_s3 + $0xf0] sm:$0xff]  ;;  %v791_v19 = vadd.f32 %v2910_v58, %v762_v11  ;;  %1155 = vmatpush.msra.mxu3 %v2138_v15  ;;  %v2120_v58 = vld [vmem:[%s3847_s3 + $0x168] sm:$0xff] }
  0xea   :  { %1036 = vmatpush.msra.mxu0 %v1033_v16  ;;  %1078 = vmatpush.msra.mxu1 %v2105_v17  ;;  %v2100_v15 = vld [vmem:[%s3847_s3 + $0xc8] sm:$0xff] }
  0xeb   :  { %v2927_v23 = vmax.f32 %v950_v20, 0.0  ;;  %1156 = vmatpush.msra.mxu3 %v2137_v24  ;;  %1118 = vmatpush.msra.mxu2 %v2120_v58  ;;  %v2116_v16 = vld [vmem:[%s3847_s3 + $0x148] sm:$0xff]  ;;  %v2098_v24 = vld [vmem:[%s3847_s3 + $0xb8] sm:$0xff]  ;;  %v2097_v58 = vld [vmem:[%s3847_s3 + $0xb0] sm:$0xff] }
  0xec   :  { %1079 = vmatpush.msra.mxu1 %v2104_v55  ;;  %v2132_v17 = vld [vmem:[%s3847_s3 + $0x1c8] sm:$0xff]  ;;  %v1025_v55 = vld [vmem:[%s3847_s3 + $0x30] sm:$0xff] }
  0xed   :  { %977 = vst [vmem:[%s3851_s7] sm:$0xff] %v2927_v23  ;;  %985 = vrot.lane.b32.xlu0 %v2927_v23, %s2458_s17  ;;  %1119 = vmatpush.msra.mxu2 %v2119_v32  ;;  %v2128_v32 = vld [vmem:[%s3847_s3 + $0x1a8] sm:$0xff] }
  0xee   :  { %v922_v26 = vpop.f32.mrf.mxu2  ;;  %v867_v30 = vpop.f32.mrf.mxu0 }
  0xef   :  { %v951_v27 = vpop.f32.mrf.mxu3  ;;  %v923_v29 = vadd.f32 %v922_v26, %v894_v25  ;;  %v896_v31 = vpop.f32.mrf.mxu1  ;;  %v868_v34 = vadd.f32 %v867_v30, %v839_v28  ;;  %v1032_v25 = vld [vmem:[%s3847_s3 + $0x68] sm:$0xff]  ;;  %v1031_v30 = vld [vmem:[%s3847_s3 + $0x60] sm:$0xff] }
  0xf0   :  { %1037 = vmatpush.msra.mxu0 %v1032_v25  ;;  %v2114_v25 = vld [vmem:[%s3847_s3 + $0x138] sm:$0xff] }
  0xf1   :  { %v952_v33 = vadd.f32 %v951_v27, %v923_v29  ;;  %v897_v38 = vadd.f32 %v896_v31, %v868_v34  ;;  %v2136_v27 = vld [vmem:[%s3847_s3 + $0x1e8] sm:$0xff]  ;;  %v2103_v31 = vld [vmem:[%s3847_s3 + $0xe0] sm:$0xff] }
  0xf2   :  { %1157 = vmatpush.msra.mxu3 %v2136_v27  ;;  %1038 = vmatpush.msra.mxu0 %v1031_v30  ;;  %v2113_v27 = vld [vmem:[%s3847_s3 + $0x130] sm:$0xff]  ;;  %v2096_v30 = vld [vmem:[%s3847_s3 + $0xa8] sm:$0xff] }
  0xf3   :  { %v2937_v37 = vmax.f32 %v952_v33, 0.0  ;;  %v820_v33 = vadd.f32 %v2913_v60, %v791_v19  ;;  %1080 = vmatpush.msra.mxu1 %v2103_v31  ;;  %v2118_v60 = vld [vmem:[%s3847_s3 + $0x158] sm:$0xff]  ;;  %v2099_v19 = vld [vmem:[%s3847_s3 + $0xc0] sm:$0xff]  ;;  %v2112_v31 = vld [vmem:[%s3847_s3 + $0x128] sm:$0xff] }
  0xf4   :  { %1158 = vmatpush.msra.mxu3 %v2135_v35  ;;  %1039 = vmatpush.msra.mxu0 %v1030_v36  ;;  %v2095_v35 = vld [vmem:[%s3847_s3 + $0xa0] sm:$0xff] }
  0xf5   :  { %978 = vst [vmem:[%s3851_s7 + $0x8] sm:$0xff] %v2937_v37  ;;  %987 = vrot.lane.b32.xlu1 %v2937_v37, %s2458_s17  ;;  %1120 = vmatpush.msra.mxu2 %v2118_v60  ;;  %v2111_v36 = vld [vmem:[%s3847_s3 + $0x120] sm:$0xff]  ;;  %v1022_v60 = vld [vmem:[%s3847_s3 + $0x18] sm:$0xff] }
  0xf6   :  { %v925_v39 = vpop.f32.mrf.mxu2  ;;  %v869_v44 = vpop.f32.mrf.mxu0  ;;  %1040 = vmatpush.msra.mxu0 %v1029_v13  ;;  %v2151_v13 = vld [vmem:[%s3847_s3 + $0x260] sm:$0xff] }
  0xf7   :  { %v954_v40 = vpop.f32.mrf.mxu3  ;;  %v926_v43 = vadd.f32 %v925_v39, %v897_v38  ;;  %v898_v45 = vpop.f32.mrf.mxu1  ;;  %v870_v48 = vadd.f32 %v869_v44, %v841_v41  ;;  %v2102_v38 = vld [vmem:[%s3847_s3 + $0xd8] sm:$0xff]  ;;  %v764_v39 = vadd.f32 %v2906_v56, %v2917_v63  ;;  %v849_v56 = vadd.f32 %v2915_v61, %v820_v33  ;;  %1121 = vmatpush.msra.mxu2 %v2117_v54  ;;  %v1023_v33 = vld [vmem:[%s3847_s3 + $0x20] sm:$0xff] }
  0xf8   :  { %v2134_v41 = vld [vmem:[%s3847_s3 + $0x1d8] sm:$0xff]  ;;  %1081 = vmatpush.msra.mxu1 %v2102_v38  ;;  %v2127_v38 = vld [vmem:[%s3847_s3 + $0x1a0] sm:$0xff] }
  0xf9   :  { %v955_v46 = vadd.f32 %v954_v40, %v926_v43  ;;  %v899_v2 = vadd.f32 %v898_v45, %v870_v48  ;;  %1159 = vmatpush.msra.mxu3 %v2134_v41  ;;  %1122 = vmatpush.msra.mxu2 %v2116_v16  ;;  %v2126_v41 = vld [vmem:[%s3847_s3 + $0x198] sm:$0xff]  ;;  %v2183_v54 = vld [vmem:[%s3847_s3 + $0x360] sm:$0xff] }
  0xfa   :  { %1082 = vmatpush.msra.mxu1 %v2101_v53  ;;  %v2167_v53 = vld [vmem:[%s3847_s3 + $0x2e0] sm:$0xff]  ;;  %v2182_v16 = vld [vmem:[%s3847_s3 + $0x358] sm:$0xff] }
  0xfb   :  { %v2947_v62 = vmax.f32 %v955_v46, 0.0  ;;  %v793_v46 = vadd.f32 %v2919_v0, %v764_v39  ;;  %v2094_v39 = vld [vmem:[%s3847_s3 + $0x98] sm:$0xff] }
  0xfc   :  { %1083 = vmatpush.msra.mxu1 %v2100_v15  ;;  %v2166_v15 = vld [vmem:[%s3847_s3 + $0x2d8] sm:$0xff] }
  0xfd   :  { %979 = vst [vmem:[%s3851_s7 + $0x10] sm:$0xff] %v2947_v62  ;;  %989 = vrot.lane.b32.xlu2 %v2947_v62, %s2458_s17  ;;  %v822_v1 = vadd.f32 %v2922_v3, %v793_v46  ;;  %v2108_v46 = vld [vmem:[%s3847_s3 + $0x108] sm:$0xff] }
  0xfe   :  { %v927_v47 = vpop.f32.mrf.mxu2  ;;  %v872_v50 = vpop.f32.mrf.mxu0  ;;  %1084 = vmatpush.msra.mxu1 %v2099_v19  ;;  %v2165_v19 = vld [vmem:[%s3847_s3 + $0x2d0] sm:$0xff] }
  0xff   :  { %v956_v49 = vpop.f32.mrf.mxu3  ;;  %v928_v6 = vadd.f32 %v927_v47, %v899_v2  ;;  %v901_v7 = vpop.f32.mrf.mxu1  ;;  %v873_v52 = vadd.f32 %v872_v50, %v844_v5 }
 0x100   :  { %1085 = vmatpush.msra.mxu1 %v2098_v24  ;;  %v2164_v24 = vld [vmem:[%s3847_s3 + $0x2c8] sm:$0xff] }
 0x101   :  { %v957_v9 = vadd.f32 %v956_v49, %v928_v6  ;;  %v902_v51 = vadd.f32 %v901_v7, %v873_v52  ;;  %v851_v49 = vadd.f32 %v2924_v4, %v822_v1  ;;  %v2091_v1 = vld [vmem:[%s3847_s3 + $0x80] sm:$0xff] }
 0x102   :  { %1086 = vmatpush.msra.mxu1 %v2097_v58  ;;  %v2163_v58 = vld [vmem:[%s3847_s3 + $0x2c0] sm:$0xff] }
 0x103   :  { %v2962_v12 = vmax.f32 %v957_v9, 0.0 }
 0x104   :  { %1087 = vmatpush.msra.mxu1 %v2096_v30  ;;  %v2162_v30 = vld [vmem:[%s3847_s3 + $0x2b8] sm:$0xff] }
 0x105   :  { %980 = vst [vmem:[%s3851_s7 + $0x18] sm:$0xff] %v2962_v12 }
 0x106   :  { %v930_v57 = vpop.f32.mrf.mxu2  ;;  %v874_v21 = vpop.f32.mrf.mxu0  ;;  %1088 = vmatpush.msra.mxu1 %v2095_v35  ;;  %v2161_v35 = vld [vmem:[%s3847_s3 + $0x2b0] sm:$0xff] }
 0x107   :  { %v959_v14 = vpop.f32.mrf.mxu3  ;;  %v931_v20 = vadd.f32 %v930_v57, %v902_v51  ;;  %v903_v26 = vpop.f32.mrf.mxu1  ;;  %v875_v29 = vadd.f32 %v874_v21, %v846_v18  ;;  %v2133_v57 = vld [vmem:[%s3847_s3 + $0x1d0] sm:$0xff]  ;;  %v1027_v18 = vld [vmem:[%s3847_s3 + $0x40] sm:$0xff] }
 0x108   :  { %1160 = vmatpush.msra.mxu3 %v2133_v57  ;;  %v2131_v21 = vld [vmem:[%s3847_s3 + $0x1c0] sm:$0xff]  ;;  %1089 = vmatpush.msra.mxu1 %v2094_v39  ;;  %v2160_v39 = vld [vmem:[%s3847_s3 + $0x2a8] sm:$0xff] }
 0x109   :  { %v960_v28 = vadd.f32 %v959_v14, %v931_v20  ;;  %v904_v40 = vadd.f32 %v903_v26, %v875_v29  ;;  %v1028_v14 = vld [vmem:[%s3847_s3 + $0x48] sm:$0xff]  ;;  %v2115_v20 = vld [vmem:[%s3847_s3 + $0x140] sm:$0xff]  ;;  %v2130_v26 = vld [vmem:[%s3847_s3 + $0x1b8] sm:$0xff] }
 0x10a   :  { %1041 = vmatpush.msra.mxu0 %v1028_v14  ;;  %1161 = vmatpush.msra.mxu3 %v2132_v17  ;;  %v1024_v29 = vld [vmem:[%s3847_s3 + $0x28] sm:$0xff]  ;;  %v2199_v57 = vld [vmem:[%s3847_s3 + $0x3e0] sm:$0xff]  ;;  %v2150_v14 = vld [vmem:[%s3847_s3 + $0x258] sm:$0xff] }
 0x10b   :  { %v3016_v34 = vmax.f32 %v960_v28, 0.0  ;;  %1123 = vmatpush.msra.mxu2 %v2115_v20  ;;  %v2129_v28 = vld [vmem:[%s3847_s3 + $0x1b0] sm:$0xff]  ;;  %v2198_v17 = vld [vmem:[%s3847_s3 + $0x3d8] sm:$0xff] }
 0x10c   :  { %1042 = vmatpush.msra.mxu0 %v1027_v18  ;;  %1162 = vmatpush.msra.mxu3 %v2131_v21  ;;  %v2149_v18 = vld [vmem:[%s3847_s3 + $0x250] sm:$0xff] }
 0x10d   :  { %981 = vst [vmem:[%s3851_s7 + $0x20] sm:$0xff] %v3016_v34  ;;  %993 = vrot.lane.b32.xlu0 %v3016_v34, %s2458_s17  ;;  %1124 = vmatpush.msra.mxu2 %v2114_v25  ;;  %v2181_v20 = vld [vmem:[%s3847_s3 + $0x350] sm:$0xff]  ;;  %v2180_v25 = vld [vmem:[%s3847_s3 + $0x348] sm:$0xff] }
 0x10e   :  { %v932_v42 = vpop.f32.mrf.mxu2  ;;  %v877_v44 = vpop.f32.mrf.mxu0  ;;  %1043 = vmatpush.msra.mxu0 %v1026_v22  ;;  %1163 = vmatpush.msra.mxu3 %v2130_v26  ;;  %v2197_v21 = vld [vmem:[%s3847_s3 + $0x3d0] sm:$0xff]  ;;  %v2148_v22 = vld [vmem:[%s3847_s3 + $0x248] sm:$0xff] }
 0x10f   :  { %v961_v43 = vpop.f32.mrf.mxu3  ;;  %v933_v63 = vadd.f32 %v932_v42, %v904_v40  ;;  %v906_v45 = vpop.f32.mrf.mxu1  ;;  %v878_v59 = vadd.f32 %v877_v44, %v849_v56  ;;  %1125 = vmatpush.msra.mxu2 %v2113_v27  ;;  %v2110_v40 = vld [vmem:[%s3847_s3 + $0x118] sm:$0xff]  ;;  %v1021_v42 = vld [vmem:[%s3847_s3 + $0x10] sm:$0xff]  ;;  %v1020_v44 = vld [vmem:[%s3847_s3 + $0x8] sm:$0xff] }
 0x110   :  { %1044 = vmatpush.msra.mxu0 %v1025_v55  ;;  %1164 = vmatpush.msra.mxu3 %v2129_v28  ;;  %v2109_v56 = vld [vmem:[%s3847_s3 + $0x110] sm:$0xff]  ;;  %v2196_v26 = vld [vmem:[%s3847_s3 + $0x3c8] sm:$0xff]  ;;  %v2147_v55 = vld [vmem:[%s3847_s3 + $0x240] sm:$0xff] }
 0x111   :  { %v962_v48 = vadd.f32 %v961_v43, %v933_v63  ;;  %v907_v61 = vadd.f32 %v906_v45, %v878_v59  ;;  %1126 = vmatpush.msra.mxu2 %v2112_v31  ;;  %v2093_v43 = vld [vmem:[%s3847_s3 + $0x90] sm:$0xff]  ;;  %v2092_v45 = vld [vmem:[%s3847_s3 + $0x88] sm:$0xff]  ;;  %v1019_v59 = vld [vmem:[%s3847_s3] sm:$0xff] }
 0x112   :  { %1045 = vmatpush.msra.mxu0 %v1024_v29  ;;  %1165 = vmatpush.msra.mxu3 %v2128_v32  ;;  %v2125_v63 = vld [vmem:[%s3847_s3 + $0x190] sm:$0xff]  ;;  %v2179_v27 = vld [vmem:[%s3847_s3 + $0x340] sm:$0xff]  ;;  %v2146_v29 = vld [vmem:[%s3847_s3 + $0x238] sm:$0xff] }
 0x113   :  { %v3044_v2 = vmax.f32 %v962_v48, 0.0  ;;  %1127 = vmatpush.msra.mxu2 %v2111_v36  ;;  %1090 = vmatpush.msra.mxu1 %v2093_v43  ;;  %v2124_v48 = vld [vmem:[%s3847_s3 + $0x188] sm:$0xff]  ;;  %v2195_v28 = vld [vmem:[%s3847_s3 + $0x3c0] sm:$0xff]  ;;  %v2178_v31 = vld [vmem:[%s3847_s3 + $0x338] sm:$0xff] }
 0x114   :  { %1046 = vmatpush.msra.mxu0 %v1023_v33  ;;  %1166 = vmatpush.msra.mxu3 %v2127_v38  ;;  %v2194_v32 = vld [vmem:[%s3847_s3 + $0x3b8] sm:$0xff]  ;;  %v2145_v33 = vld [vmem:[%s3847_s3 + $0x230] sm:$0xff]  ;;  %v2159_v43 = vld [vmem:[%s3847_s3 + $0x2a0] sm:$0xff] }
 0x115   :  { %982 = vst [vmem:[%s3851_s7 + $0x28] sm:$0xff] %v3044_v2  ;;  %995 = vrot.lane.b32.xlu1 %v3044_v2, %s2458_s17  ;;  %991 = vrot.lane.b32.xlu0 %v2962_v12, %s2458_s17  ;;  %v2177_v36 = vld [vmem:[%s3847_s3 + $0x330] sm:$0xff] }
 0x116   :  { %v935_v47 = vpop.f32.mrf.mxu2  ;;  %v879_v3 = vpop.f32.mrf.mxu0  ;;  %1047 = vmatpush.msra.mxu0 %v1022_v60  ;;  %1128 = vmatpush.msra.mxu2 %v2110_v40  ;;  %v2193_v38 = vld [vmem:[%s3847_s3 + $0x3b0] sm:$0xff]  ;;  %v2144_v60 = vld [vmem:[%s3847_s3 + $0x228] sm:$0xff] }
 0x117   :  { %v964_v0 = vpop.f32.mrf.mxu3  ;;  %v936_v5 = vadd.f32 %v935_v47, %v907_v61  ;;  %v880_v6 = vadd.f32 %v879_v3, %v851_v49  ;;  %v908_v7 = vpop.f32.mrf.mxu1  ;;  %1167 = vmatpush.msra.mxu3 %v2126_v41  ;;  %1091 = vmatpush.msra.mxu1 %v2092_v45  ;;  %v2107_v61 = vld [vmem:[%s3847_s3 + $0x100] sm:$0xff]  ;;  %v2170_v49 = vld [vmem:[%s3847_s3 + $0x2f8] sm:$0xff]  ;;  %v2176_v40 = vld [vmem:[%s3847_s3 + $0x328] sm:$0xff] }
 0x118   :  { %1048 = vmatpush.msra.mxu0 %v1021_v42  ;;  %1129 = vmatpush.msra.mxu2 %v2109_v56  ;;  %v2123_v47 = vld [vmem:[%s3847_s3 + $0x180] sm:$0xff]  ;;  %v2202_v3 = vld [vmem:[%s3847_s3 + $0x3f8] sm:$0xff]  ;;  %v2192_v41 = vld [vmem:[%s3847_s3 + $0x3a8] sm:$0xff] }
 0x119   :  { %v965_v50 = vadd.f32 %v964_v0, %v936_v5  ;;  %v909_v9 = vadd.f32 %v908_v7, %v880_v6  ;;  %1168 = vmatpush.msra.mxu3 %v2125_v63  ;;  %v2154_v0 = vld [vmem:[%s3847_s3 + $0x278] sm:$0xff]  ;;  %1092 = vmatpush.msra.mxu1 %v2091_v1  ;;  %v2153_v6 = vld [vmem:[%s3847_s3 + $0x270] sm:$0xff]  ;;  %v2143_v42 = vld [vmem:[%s3847_s3 + $0x220] sm:$0xff] }
 0x11a   :  { %1049 = vmatpush.msra.mxu0 %v1020_v44  ;;  %1130 = vmatpush.msra.mxu2 %v2108_v46  ;;  %v2186_v5 = vld [vmem:[%s3847_s3 + $0x378] sm:$0xff]  ;;  %v2185_v7 = vld [vmem:[%s3847_s3 + $0x370] sm:$0xff]  ;;  %v2175_v56 = vld [vmem:[%s3847_s3 + $0x320] sm:$0xff] }
 0x11b   :  { %v3055_v8 = vmax.f32 %v965_v50, 0.0  ;;  %1169 = vmatpush.msra.mxu3 %v2124_v48  ;;  %v2169_v50 = vld [vmem:[%s3847_s3 + $0x2f0] sm:$0xff]  ;;  %1233 = vmatpush.msrb.mxu1 %v2170_v49  ;;  %v2191_v63 = vld [vmem:[%s3847_s3 + $0x3a0] sm:$0xff]  ;;  %v2142_v44 = vld [vmem:[%s3847_s3 + $0x218] sm:$0xff] }
 0x11c   :  { %1050 = vmatpush.msra.mxu0 %v1019_v59  ;;  %1131 = vmatpush.msra.mxu2 %v2107_v61  ;;  %v2158_v45 = vld [vmem:[%s3847_s3 + $0x298] sm:$0xff]  ;;  %v2141_v59 = vld [vmem:[%s3847_s3 + $0x210] sm:$0xff]  ;;  %v2156_v49 = vld [vmem:[%s3847_s3 + $0x288] sm:$0xff] }
 0x11d   :  { %983 = vst [vmem:[%s3851_s7 + $0x30] sm:$0xff] %v3055_v8  ;;  %997 = vrot.lane.b32.xlu2 %v3055_v8, %s2458_s17  ;;  %1170 = vmatpush.msra.mxu3 %v2123_v47  ;;  %v2174_v46 = vld [vmem:[%s3847_s3 + $0x318] sm:$0xff]  ;;  %v2157_v1 = vld [vmem:[%s3847_s3 + $0x290] sm:$0xff] }
 0x11e   :  { %v937_v52 = vpop.f32.mrf.mxu2  ;;  %1194 = vmatpush.msrb.mxu0 %v2154_v0  ;;  %1272 = vmatpush.msrb.mxu2 %v2186_v5  ;;  %v2190_v48 = vld [vmem:[%s3847_s3 + $0x398] sm:$0xff]  ;;  %v2173_v61 = vld [vmem:[%s3847_s3 + $0x310] sm:$0xff]  ;;  %v2140_v0 = vld [vmem:[%s3847_s3 + $0x208] sm:$0xff] }
 0x11f   :  { %v966_v10 = vpop.f32.mrf.mxu3  ;;  %v938_v11 = vadd.f32 %v937_v52, %v909_v9  ;;  %v2201_v9 = vld [vmem:[%s3847_s3 + $0x3f0] sm:$0xff]  ;;  %1311 = vmatpush.msrb.mxu3 %v2202_v3  ;;  %v2152_v52 = vld [vmem:[%s3847_s3 + $0x268] sm:$0xff]  ;;  %1234 = vmatpush.msrb.mxu1 %v2169_v50  ;;  %v2155_v50 = vld [vmem:[%s3847_s3 + $0x280] sm:$0xff] }
 0x120   :  { %1195 = vmatpush.msrb.mxu0 %v2153_v6  ;;  %1273 = vmatpush.msrb.mxu2 %v2185_v7  ;;  %v2189_v47 = vld [vmem:[%s3847_s3 + $0x390] sm:$0xff]  ;;  %v2172_v5 = vld [vmem:[%s3847_s3 + $0x308] sm:$0xff]  ;;  %v2139_v6 = vld [vmem:[%s3847_s3 + $0x200] sm:$0xff] }
 0x121   :  { %v967_v4 = vadd.f32 %v966_v10, %v938_v11  ;;  %v2168_v10 = vld [vmem:[%s3847_s3 + $0x2e8] sm:$0xff]  ;;  %1312 = vmatpush.msrb.mxu3 %v2201_v9  ;;  %v2171_v7 = vld [vmem:[%s3847_s3 + $0x300] sm:$0xff] }
 0x122   :  { %v2184_v11 = vld [vmem:[%s3847_s3 + $0x368] sm:$0xff]  ;;  %1196 = vmatpush.msrb.mxu0 %v2152_v52  ;;  %1235 = vmatpush.msrb.mxu1 %v2168_v10  ;;  %v2187_v9 = vld [vmem:[%s3847_s3 + $0x380] sm:$0xff] }
 0x123   :  { %v3063_v51 = vmax.f32 %v967_v4, 0.0  ;;  %v2200_v4 = vld [vmem:[%s3847_s3 + $0x3e8] sm:$0xff]  ;;  %1274 = vmatpush.msrb.mxu2 %v2184_v11 }
 0x124   :  { %1313 = vmatpush.msrb.mxu3 %v2200_v4  ;;  %1197 = vmatpush.msrb.mxu0 %v2151_v13  ;;  %v2188_v3 = vld [vmem:[%s3847_s3 + $0x388] sm:$0xff] }
 0x125   :  { %984 = vst [vmem:[%s3851_s7 + $0x38] sm:$0xff] %v3063_v51  ;;  %999 = vrot.lane.b32.xlu1 %v3063_v51, %s2458_s17  ;;  %1236 = vmatpush.msrb.mxu1 %v2167_v53 }
 0x126   :  { %1275 = vmatpush.msrb.mxu2 %v2183_v54  ;;  %1314 = vmatpush.msrb.mxu3 %v2199_v57 }
 0x127   :  { %1198 = vmatpush.msrb.mxu0 %v2150_v14  ;;  %1237 = vmatpush.msrb.mxu1 %v2166_v15 }
 0x128   :  { %1276 = vmatpush.msrb.mxu2 %v2182_v16  ;;  %1315 = vmatpush.msrb.mxu3 %v2198_v17 }
 0x129   :  { %1199 = vmatpush.msrb.mxu0 %v2149_v18  ;;  %1238 = vmatpush.msrb.mxu1 %v2165_v19 }
 0x12a   :  { %1277 = vmatpush.msrb.mxu2 %v2181_v20  ;;  %1316 = vmatpush.msrb.mxu3 %v2197_v21 }
 0x12b   :  { %1200 = vmatpush.msrb.mxu0 %v2148_v22  ;;  %1239 = vmatpush.msrb.mxu1 %v2164_v24  ;;  %v2217_v24 = vld [vmem:[%s3847_s3 + $0x470] sm:$0xff] }
 0x12c   :  { %1278 = vmatpush.msrb.mxu2 %v2180_v25  ;;  %1317 = vmatpush.msrb.mxu3 %v2196_v26  ;;  %v2233_v25 = vld [vmem:[%s3847_s3 + $0x4f0] sm:$0xff] }
 0x12d   :  { %1201 = vmatpush.msrb.mxu0 %v2147_v55  ;;  %1240 = vmatpush.msrb.mxu1 %v2163_v58  ;;  %v2249_v26 = vld [vmem:[%s3847_s3 + $0x570] sm:$0xff]  ;;  %v2216_v58 = vld [vmem:[%s3847_s3 + $0x468] sm:$0xff] }
 0x12e   :  { %1279 = vmatpush.msrb.mxu2 %v2179_v27  ;;  %1318 = vmatpush.msrb.mxu3 %v2195_v28  ;;  %v2265_v55 = vld [vmem:[%s3847_s3 + $0x5f0] sm:$0xff]  ;;  %v2232_v27 = vld [vmem:[%s3847_s3 + $0x4e8] sm:$0xff] }
 0x12f   :  { %1202 = vmatpush.msrb.mxu0 %v2146_v29  ;;  %1241 = vmatpush.msrb.mxu1 %v2162_v30  ;;  %v2248_v28 = vld [vmem:[%s3847_s3 + $0x568] sm:$0xff]  ;;  %v2215_v30 = vld [vmem:[%s3847_s3 + $0x460] sm:$0xff] }
 0x130   :  { %1280 = vmatpush.msrb.mxu2 %v2178_v31  ;;  %1319 = vmatpush.msrb.mxu3 %v2194_v32  ;;  %v2264_v29 = vld [vmem:[%s3847_s3 + $0x5e8] sm:$0xff]  ;;  %v2231_v31 = vld [vmem:[%s3847_s3 + $0x4e0] sm:$0xff] }
 0x131   :  { %1203 = vmatpush.msrb.mxu0 %v2145_v33  ;;  %1242 = vmatpush.msrb.mxu1 %v2161_v35  ;;  %v2247_v32 = vld [vmem:[%s3847_s3 + $0x560] sm:$0xff] }
 0x132   :  { %1281 = vmatpush.msrb.mxu2 %v2177_v36  ;;  %1320 = vmatpush.msrb.mxu3 %v2193_v38  ;;  %v2263_v33 = vld [vmem:[%s3847_s3 + $0x5e0] sm:$0xff] }
 0x133   :  { %1204 = vmatpush.msrb.mxu0 %v2144_v60  ;;  %1243 = vmatpush.msrb.mxu1 %v2160_v39 }
 0x134   :  { %1282 = vmatpush.msrb.mxu2 %v2176_v40  ;;  %1321 = vmatpush.msrb.mxu3 %v2192_v41  ;;  %v2214_v40 = vld [vmem:[%s3847_s3 + $0x458] sm:$0xff] }
 0x135   :  { %1205 = vmatpush.msrb.mxu0 %v2143_v42  ;;  %1244 = vmatpush.msrb.mxu1 %v2159_v43  ;;  %v2230_v41 = vld [vmem:[%s3847_s3 + $0x4d8] sm:$0xff] }
 0x136   :  { %1283 = vmatpush.msrb.mxu2 %v2175_v56  ;;  %1322 = vmatpush.msrb.mxu3 %v2191_v63  ;;  %v2246_v42 = vld [vmem:[%s3847_s3 + $0x558] sm:$0xff]  ;;  %v2213_v56 = vld [vmem:[%s3847_s3 + $0x450] sm:$0xff] }
 0x137   :  { %1206 = vmatpush.msrb.mxu0 %v2142_v44  ;;  %1245 = vmatpush.msrb.mxu1 %v2158_v45  ;;  %v2262_v43 = vld [vmem:[%s3847_s3 + $0x5d8] sm:$0xff]  ;;  %v2229_v63 = vld [vmem:[%s3847_s3 + $0x4d0] sm:$0xff] }
 0x138   :  { %1284 = vmatpush.msrb.mxu2 %v2174_v46  ;;  %1323 = vmatpush.msrb.mxu3 %v2190_v48  ;;  %v2245_v46 = vld [vmem:[%s3847_s3 + $0x550] sm:$0xff] }
 0x139   :  { %1207 = vmatpush.msrb.mxu0 %v2141_v59  ;;  %1246 = vmatpush.msrb.mxu1 %v2157_v1  ;;  %v2261_v48 = vld [vmem:[%s3847_s3 + $0x5d0] sm:$0xff]  ;;  %v2212_v1 = vld [vmem:[%s3847_s3 + $0x448] sm:$0xff] }
 0x13a   :  { %1285 = vmatpush.msrb.mxu2 %v2173_v61  ;;  %1324 = vmatpush.msrb.mxu3 %v2189_v47  ;;  %v2244_v47 = vld [vmem:[%s3847_s3 + $0x548] sm:$0xff] }
 0x13b   :  { %1208 = vmatpush.msrb.mxu0 %v2140_v0  ;;  %1247 = vmatpush.msrb.mxu1 %v2156_v49  ;;  %v2211_v0 = vld [vmem:[%s3847_s3 + $0x440] sm:$0xff] }
 0x13c   :  { %1286 = vmatpush.msrb.mxu2 %v2172_v5  ;;  %1325 = vmatpush.msrb.mxu3 %v2188_v3  ;;  %v2227_v49 = vld [vmem:[%s3847_s3 + $0x4c0] sm:$0xff] }
 0x13d   :  { %1209 = vmatpush.msrb.mxu0 %v2139_v6  ;;  %1248 = vmatpush.msrb.mxu1 %v2155_v50  ;;  %v2243_v5 = vld [vmem:[%s3847_s3 + $0x540] sm:$0xff]  ;;  %v2210_v6 = vld [vmem:[%s3847_s3 + $0x438] sm:$0xff] }
 0x13e   :  { %1287 = vmatpush.msrb.mxu2 %v2171_v7  ;;  %1326 = vmatpush.msrb.mxu3 %v2187_v9  ;;  %v2259_v3 = vld [vmem:[%s3847_s3 + $0x5c0] sm:$0xff]  ;;  %v2226_v50 = vld [vmem:[%s3847_s3 + $0x4b8] sm:$0xff] }
 0x13f   :  { %v2242_v7 = vld [vmem:[%s3847_s3 + $0x538] sm:$0xff] }
 0x140   :  { %v2258_v9 = vld [vmem:[%s3847_s3 + $0x5b8] sm:$0xff] }
 0x157   :  { %v990_v52 = vpop.permute.xlu2 %989 }
 0x158   :  { %v1003_v4 = vmax.f32 %v2947_v62, %v990_v52  ;;  %v2218_v62 = vld [vmem:[%s3847_s3 + $0x478] sm:$0xff]  ;;  %v2209_v52 = vld [vmem:[%s3847_s3 + $0x430] sm:$0xff] }
 0x15f   :  { %v986_v10 = vpop.permute.xlu0 %985 }
 0x160   :  { %v1001_v14 = vmax.f32 %v2927_v23, %v986_v10  ;;  %v2225_v10 = vld [vmem:[%s3847_s3 + $0x4b0] sm:$0xff] }
 0x167   :  { %v988_v54 = vpop.permute.xlu1 %987 }
 0x168   :  { %v1002_v18 = vmax.f32 %v2937_v37, %v988_v54  ;;  %v2250_v37 = vld [vmem:[%s3847_s3 + $0x578] sm:$0xff]  ;;  %v2240_v54 = vld [vmem:[%s3847_s3 + $0x528] sm:$0xff] }
 0x177   :  { %v998_v11 = vpop.permute.xlu2 %997 }
 0x178   :  { %v1007_v13 = vmax.f32 %v3055_v8, %v998_v11  ;;  %v2234_v8 = vld [vmem:[%s3847_s3 + $0x4f8] sm:$0xff]  ;;  %v2241_v11 = vld [vmem:[%s3847_s3 + $0x530] sm:$0xff] }
 0x17a   :  { %v1011_v53 = vmax.f32 %v1003_v4, %v1007_v13  ;;  %v2257_v4 = vld [vmem:[%s3847_s3 + $0x5b0] sm:$0xff]  ;;  %v2208_v13 = vld [vmem:[%s3847_s3 + $0x428] sm:$0xff] }
 0x17c   :  { %1015 = vst [vmem:[#allocation2 + $0x10] sm:$0xff] %v1011_v53  ;;  %v2224_v53 = vld [vmem:[%s3847_s3 + $0x4a8] sm:$0xff] }
 0x17f   :  { %v994_v57 = vpop.permute.xlu0 %993 }
 0x180   :  { %v1005_v15 = vmax.f32 %v3016_v34, %v994_v57  ;;  %v2256_v57 = vld [vmem:[%s3847_s3 + $0x5a8] sm:$0xff] }
 0x182   :  { %v1009_v16 = vmax.f32 %v1001_v14, %v1005_v15  ;;  %v2207_v14 = vld [vmem:[%s3847_s3 + $0x420] sm:$0xff] }
 0x183   :  { %v2223_v15 = vld [vmem:[%s3847_s3 + $0x4a0] sm:$0xff] }
 0x184   :  { %1013 = vst [vmem:[#allocation2] sm:$0xff] %v1009_v16  ;;  %v2239_v16 = vld [vmem:[%s3847_s3 + $0x520] sm:$0xff] }
 0x187   :  { %v996_v17 = vpop.permute.xlu1 %995  ;;  %v992_v39 = vpop.permute.xlu0 %991 }
 0x188   :  { %v1006_v19 = vmax.f32 %v3044_v2, %v996_v17  ;;  %v2266_v2 = vld [vmem:[%s3847_s3 + $0x5f8] sm:$0xff]  ;;  %v1004_v45 = vmax.f32 %v2962_v12, %v992_v39  ;;  %v2228_v12 = vld [vmem:[%s3847_s3 + $0x4c8] sm:$0xff]  ;;  %v2255_v17 = vld [vmem:[%s3847_s3 + $0x5a0] sm:$0xff] }
 0x189   :  { %v2329_v39 = vld [vmem:[%s3847_s3 + $0x7f0] sm:$0xff] }
 0x18a   :  { %v1010_v20 = vmax.f32 %v1002_v18, %v1006_v19  ;;  %v2206_v18 = vld [vmem:[%s3847_s3 + $0x418] sm:$0xff] }
 0x18b   :  { %v1018_v21 = vld [vmem:[#allocation2] sm:$0x3]  ;;  %v1059_v23 = vld [vmem:[#allocation2 + $0x2] sm:$0x3]  ;;  %v1098_v22 = vld [vmem:[#allocation2 + $0x4] sm:$0x3] }
 0x18c   :  { %1014 = vst [vmem:[#allocation2 + $0x8] sm:$0xff] %v1010_v20  ;;  %1051 = vmatmul.f32.vlgmr.msra.gmra.mxu0 %v1018_v21  ;;  %1093 = vmatmul.f32.vlgmr.msra.gmra.mxu1 %v1059_v23  ;;  %v1137_v34 = vld [vmem:[#allocation2 + $0x6] sm:$0x3]  ;;  %v2222_v19 = vld [vmem:[%s3847_s3 + $0x498] sm:$0xff]  ;;  %v2221_v21 = vld [vmem:[%s3847_s3 + $0x490] sm:$0xff] }
 0x18d   :  { %1132 = vmatmul.f32.vlgmr.msra.gmra.mxu2 %v1098_v22  ;;  %1171 = vmatmul.f32.vlgmr.msra.gmra.mxu3 %v1137_v34  ;;  %v2238_v20 = vld [vmem:[%s3847_s3 + $0x518] sm:$0xff]  ;;  %v2237_v23 = vld [vmem:[%s3847_s3 + $0x510] sm:$0xff]  ;;  %v2204_v34 = vld [vmem:[%s3847_s3 + $0x408] sm:$0xff] }
 0x18e   :  { %1350 = vmatpush.msra.mxu0 %v2218_v62  ;;  %1389 = vmatpush.msra.mxu1 %v2234_v8  ;;  %v2254_v62 = vld [vmem:[%s3847_s3 + $0x598] sm:$0xff]  ;;  %v2205_v8 = vld [vmem:[%s3847_s3 + $0x410] sm:$0xff] }
 0x18f   :  { %1428 = vmatpush.msra.mxu2 %v2250_v37  ;;  %1467 = vmatpush.msra.mxu3 %v2266_v2  ;;  %v2253_v22 = vld [vmem:[%s3847_s3 + $0x590] sm:$0xff]  ;;  %v2220_v37 = vld [vmem:[%s3847_s3 + $0x488] sm:$0xff] }
 0x190   :  { %1351 = vmatpush.msra.mxu0 %v2217_v24  ;;  %1390 = vmatpush.msra.mxu1 %v2233_v25  ;;  %v2236_v2 = vld [vmem:[%s3847_s3 + $0x508] sm:$0xff]  ;;  %v2203_v25 = vld [vmem:[%s3847_s3 + $0x400] sm:$0xff] }
 0x191   :  { %1429 = vmatpush.msra.mxu2 %v2249_v26  ;;  %1468 = vmatpush.msra.mxu3 %v2265_v55  ;;  %v2252_v24 = vld [vmem:[%s3847_s3 + $0x588] sm:$0xff]  ;;  %v2219_v26 = vld [vmem:[%s3847_s3 + $0x480] sm:$0xff] }
 0x192   :  { %1352 = vmatpush.msra.mxu0 %v2216_v58  ;;  %1391 = vmatpush.msra.mxu1 %v2232_v27  ;;  %v2235_v55 = vld [vmem:[%s3847_s3 + $0x500] sm:$0xff]  ;;  %v1332_v27 = vld [vmem:[#allocation2 + $0x10] sm:$0x3] }
 0x193   :  { %1430 = vmatpush.msra.mxu2 %v2248_v28  ;;  %1469 = vmatpush.msra.mxu3 %v2264_v29  ;;  %v1176_v35 = vld [vmem:[#allocation2 + $0x8] sm:$0x3]  ;;  %v1215_v36 = vld [vmem:[#allocation2 + $0xa] sm:$0x3]  ;;  %v1254_v38 = vld [vmem:[#allocation2 + $0xc] sm:$0x3] }
 0x194   :  { %1353 = vmatpush.msra.mxu0 %v2215_v30  ;;  %1392 = vmatpush.msra.mxu1 %v2231_v31  ;;  %v1293_v60 = vld [vmem:[#allocation2 + $0xe] sm:$0x3]  ;;  %v2251_v58 = vld [vmem:[%s3847_s3 + $0x580] sm:$0xff]  ;;  %v1371_v28 = vld [vmem:[#allocation2 + $0x12] sm:$0x3] }
 0x195   :  { %1431 = vmatpush.msra.mxu2 %v2247_v32  ;;  %1470 = vmatpush.msra.mxu3 %v2263_v33  ;;  %v1410_v29 = vld [vmem:[#allocation2 + $0x14] sm:$0x3]  ;;  %v2282_v30 = vld [vmem:[%s3847_s3 + $0x678] sm:$0xff]  ;;  %v1449_v32 = vld [vmem:[#allocation2 + $0x16] sm:$0x3] }
 0x196   :  { %1210 = vmatmul.f32.vlgmr.msrb.gmra.mxu0 %v1176_v35  ;;  %1249 = vmatmul.f32.vlgmr.msrb.gmra.mxu1 %v1215_v36  ;;  %v2298_v31 = vld [vmem:[%s3847_s3 + $0x6f8] sm:$0xff]  ;;  %v2281_v36 = vld [vmem:[%s3847_s3 + $0x670] sm:$0xff] }
 0x197   :  { %1288 = vmatmul.f32.vlgmr.msrb.gmra.mxu2 %v1254_v38  ;;  %1327 = vmatmul.f32.vlgmr.msrb.gmra.mxu3 %v1293_v60  ;;  %v1000_v44 = vpop.permute.xlu1 %999  ;;  %v2314_v33 = vld [vmem:[%s3847_s3 + $0x778] sm:$0xff]  ;;  %v2297_v38 = vld [vmem:[%s3847_s3 + $0x6f0] sm:$0xff] }
 0x198   :  { %1354 = vmatpush.msra.mxu0 %v2214_v40  ;;  %1393 = vmatpush.msra.mxu1 %v2230_v41  ;;  %v1008_v59 = vmax.f32 %v3063_v51, %v1000_v44  ;;  %v2260_v51 = vld [vmem:[%s3847_s3 + $0x5c8] sm:$0xff]  ;;  %v2330_v35 = vld [vmem:[%s3847_s3 + $0x7f8] sm:$0xff]  ;;  %v2313_v60 = vld [vmem:[%s3847_s3 + $0x770] sm:$0xff] }
 0x199   :  { %1432 = vmatpush.msra.mxu2 %v2246_v42  ;;  %1471 = vmatpush.msra.mxu3 %v2262_v43  ;;  %v2280_v40 = vld [vmem:[%s3847_s3 + $0x668] sm:$0xff]  ;;  %v2311_v44 = vld [vmem:[%s3847_s3 + $0x760] sm:$0xff] }
 0x19a   :  { %1355 = vmatpush.msra.mxu0 %v2213_v56  ;;  %1394 = vmatpush.msra.mxu1 %v2229_v63  ;;  %v1012_v61 = vmax.f32 %v1004_v45, %v1008_v59  ;;  %v2296_v41 = vld [vmem:[%s3847_s3 + $0x6e8] sm:$0xff]  ;;  %v2279_v56 = vld [vmem:[%s3847_s3 + $0x660] sm:$0xff]  ;;  %v2310_v59 = vld [vmem:[%s3847_s3 + $0x758] sm:$0xff] }
 0x19b   :  { %1433 = vmatpush.msra.mxu2 %v2245_v46  ;;  %1472 = vmatpush.msra.mxu3 %v2261_v48  ;;  %v2312_v42 = vld [vmem:[%s3847_s3 + $0x768] sm:$0xff]  ;;  %v2295_v63 = vld [vmem:[%s3847_s3 + $0x6e0] sm:$0xff]  ;;  %v2278_v46 = vld [vmem:[%s3847_s3 + $0x658] sm:$0xff] }
 0x19c   :  { %1016 = vst [vmem:[#allocation2 + $0x18] sm:$0xff] %v1012_v61  ;;  %1356 = vmatpush.msra.mxu0 %v2212_v1  ;;  %1395 = vmatpush.msra.mxu1 %v2228_v12  ;;  %v2328_v43 = vld [vmem:[%s3847_s3 + $0x7e8] sm:$0xff]  ;;  %v2327_v45 = vld [vmem:[%s3847_s3 + $0x7e0] sm:$0xff]  ;;  %v2294_v48 = vld [vmem:[%s3847_s3 + $0x6d8] sm:$0xff] }
 0x19d   :  { %1434 = vmatpush.msra.mxu2 %v2244_v47  ;;  %1473 = vmatpush.msra.mxu3 %v2260_v51  ;;  %v2326_v1 = vld [vmem:[%s3847_s3 + $0x7d8] sm:$0xff]  ;;  %v2277_v12 = vld [vmem:[%s3847_s3 + $0x650] sm:$0xff] }
 0x19e   :  { %1357 = vmatpush.msra.mxu0 %v2211_v0  ;;  %1396 = vmatpush.msra.mxu1 %v2227_v49  ;;  %v2293_v61 = vld [vmem:[%s3847_s3 + $0x6d0] sm:$0xff]  ;;  %v2276_v0 = vld [vmem:[%s3847_s3 + $0x648] sm:$0xff] }
 0x19f   :  { %1435 = vmatpush.msra.mxu2 %v2243_v5  ;;  %1474 = vmatpush.msra.mxu3 %v2259_v3  ;;  %v2309_v47 = vld [vmem:[%s3847_s3 + $0x750] sm:$0xff]  ;;  %v2292_v49 = vld [vmem:[%s3847_s3 + $0x6c8] sm:$0xff] }
 0x1a0   :  { %1358 = vmatpush.msra.mxu0 %v2210_v6  ;;  %1397 = vmatpush.msra.mxu1 %v2226_v50  ;;  %v2325_v51 = vld [vmem:[%s3847_s3 + $0x7d0] sm:$0xff]  ;;  %v2308_v5 = vld [vmem:[%s3847_s3 + $0x748] sm:$0xff]  ;;  %v2275_v6 = vld [vmem:[%s3847_s3 + $0x640] sm:$0xff] }
 0x1a1   :  { %1436 = vmatpush.msra.mxu2 %v2242_v7  ;;  %1475 = vmatpush.msra.mxu3 %v2258_v9  ;;  %v2324_v3 = vld [vmem:[%s3847_s3 + $0x7c8] sm:$0xff]  ;;  %v2291_v50 = vld [vmem:[%s3847_s3 + $0x6c0] sm:$0xff] }
 0x1a2   :  { %1359 = vmatpush.msra.mxu0 %v2209_v52  ;;  %1398 = vmatpush.msra.mxu1 %v2225_v10  ;;  %v2307_v7 = vld [vmem:[%s3847_s3 + $0x740] sm:$0xff]  ;;  %v2274_v52 = vld [vmem:[%s3847_s3 + $0x638] sm:$0xff] }
 0x1a3   :  { %1437 = vmatpush.msra.mxu2 %v2241_v11  ;;  %1476 = vmatpush.msra.mxu3 %v2257_v4  ;;  %v2323_v9 = vld [vmem:[%s3847_s3 + $0x7c0] sm:$0xff]  ;;  %v2290_v10 = vld [vmem:[%s3847_s3 + $0x6b8] sm:$0xff] }
 0x1a4   :  { %1360 = vmatpush.msra.mxu0 %v2208_v13  ;;  %1399 = vmatpush.msra.mxu1 %v2224_v53  ;;  %v2306_v11 = vld [vmem:[%s3847_s3 + $0x738] sm:$0xff]  ;;  %v2273_v13 = vld [vmem:[%s3847_s3 + $0x630] sm:$0xff] }
 0x1a5   :  { %1438 = vmatpush.msra.mxu2 %v2240_v54  ;;  %1477 = vmatpush.msra.mxu3 %v2256_v57  ;;  %v2322_v4 = vld [vmem:[%s3847_s3 + $0x7b8] sm:$0xff]  ;;  %v2289_v53 = vld [vmem:[%s3847_s3 + $0x6b0] sm:$0xff] }
 0x1a6   :  { %1361 = vmatpush.msra.mxu0 %v2207_v14  ;;  %1400 = vmatpush.msra.mxu1 %v2223_v15  ;;  %v2305_v54 = vld [vmem:[%s3847_s3 + $0x730] sm:$0xff]  ;;  %v2272_v14 = vld [vmem:[%s3847_s3 + $0x628] sm:$0xff] }
 0x1a7   :  { %1439 = vmatpush.msra.mxu2 %v2239_v16  ;;  %1478 = vmatpush.msra.mxu3 %v2255_v17  ;;  %v2321_v57 = vld [vmem:[%s3847_s3 + $0x7b0] sm:$0xff]  ;;  %v2288_v15 = vld [vmem:[%s3847_s3 + $0x6a8] sm:$0xff] }
 0x1a8   :  { %1362 = vmatpush.msra.mxu0 %v2206_v18  ;;  %1401 = vmatpush.msra.mxu1 %v2222_v19  ;;  %v2304_v16 = vld [vmem:[%s3847_s3 + $0x728] sm:$0xff]  ;;  %v2271_v18 = vld [vmem:[%s3847_s3 + $0x620] sm:$0xff] }
 0x1a9   :  { %1440 = vmatpush.msra.mxu2 %v2238_v20  ;;  %1479 = vmatpush.msra.mxu3 %v2254_v62  ;;  %v2320_v17 = vld [vmem:[%s3847_s3 + $0x7a8] sm:$0xff]  ;;  %v2287_v19 = vld [vmem:[%s3847_s3 + $0x6a0] sm:$0xff] }
 0x1aa   :  { %1363 = vmatpush.msra.mxu0 %v2205_v8  ;;  %1402 = vmatpush.msra.mxu1 %v2221_v21  ;;  %v2303_v20 = vld [vmem:[%s3847_s3 + $0x720] sm:$0xff]  ;;  %v2270_v8 = vld [vmem:[%s3847_s3 + $0x618] sm:$0xff] }
 0x1ab   :  { %1441 = vmatpush.msra.mxu2 %v2237_v23  ;;  %1480 = vmatpush.msra.mxu3 %v2253_v22  ;;  %v2319_v62 = vld [vmem:[%s3847_s3 + $0x7a0] sm:$0xff]  ;;  %v2286_v21 = vld [vmem:[%s3847_s3 + $0x698] sm:$0xff] }
 0x1ac   :  { %1364 = vmatpush.msra.mxu0 %v2204_v34  ;;  %1403 = vmatpush.msra.mxu1 %v2220_v37  ;;  %v2302_v23 = vld [vmem:[%s3847_s3 + $0x718] sm:$0xff]  ;;  %v2269_v34 = vld [vmem:[%s3847_s3 + $0x610] sm:$0xff] }
 0x1ad   :  { %1442 = vmatpush.msra.mxu2 %v2236_v2  ;;  %1481 = vmatpush.msra.mxu3 %v2252_v24  ;;  %v2318_v22 = vld [vmem:[%s3847_s3 + $0x798] sm:$0xff]  ;;  %v2285_v37 = vld [vmem:[%s3847_s3 + $0x690] sm:$0xff] }
 0x1ae   :  { %1365 = vmatpush.msra.mxu0 %v2203_v25  ;;  %1404 = vmatpush.msra.mxu1 %v2219_v26  ;;  %v2301_v2 = vld [vmem:[%s3847_s3 + $0x710] sm:$0xff]  ;;  %v2268_v25 = vld [vmem:[%s3847_s3 + $0x608] sm:$0xff] }
 0x1af   :  { %1443 = vmatpush.msra.mxu2 %v2235_v55  ;;  %1482 = vmatpush.msra.mxu3 %v2251_v58  ;;  %v2317_v24 = vld [vmem:[%s3847_s3 + $0x790] sm:$0xff]  ;;  %v2284_v26 = vld [vmem:[%s3847_s3 + $0x688] sm:$0xff] }
 0x1b0   :  { %1366 = vmatmul.f32.vlgmr.msra.gmra.mxu0 %v1332_v27  ;;  %1405 = vmatmul.f32.vlgmr.msra.gmra.mxu1 %v1371_v28  ;;  %v2300_v55 = vld [vmem:[%s3847_s3 + $0x708] sm:$0xff]  ;;  %v2267_v27 = vld [vmem:[%s3847_s3 + $0x600] sm:$0xff] }
 0x1b1   :  { %1444 = vmatmul.f32.vlgmr.msra.gmra.mxu2 %v1410_v29  ;;  %1483 = vmatmul.f32.vlgmr.msra.gmra.mxu3 %v1449_v32  ;;  %v2316_v58 = vld [vmem:[%s3847_s3 + $0x788] sm:$0xff]  ;;  %v2283_v28 = vld [vmem:[%s3847_s3 + $0x680] sm:$0xff]  ;;  %v1527_v32 = vld [vmem:[#allocation2 + $0x1a] sm:$0x3] }
 0x1b2   :  { %1506 = vmatpush.msrb.mxu0 %v2282_v30  ;;  %1545 = vmatpush.msrb.mxu1 %v2298_v31  ;;  %v2299_v29 = vld [vmem:[%s3847_s3 + $0x700] sm:$0xff]  ;;  %v1488_v31 = vld [vmem:[#allocation2 + $0x18] sm:$0x3] }
 0x1b3   :  { %1584 = vmatpush.msrb.mxu2 %v2314_v33  ;;  %1623 = vmatpush.msrb.mxu3 %v2330_v35  ;;  %v2315_v30 = vld [vmem:[%s3847_s3 + $0x780] sm:$0xff]  ;;  %v1566_v33 = vld [vmem:[#allocation2 + $0x1c] sm:$0x3]  ;;  %v1605_v35 = vld [vmem:[#allocation2 + $0x1e] sm:$0x3] }
 0x1b4   :  { %1507 = vmatpush.msrb.mxu0 %v2281_v36  ;;  %1546 = vmatpush.msrb.mxu1 %v2297_v38  ;;  %v1660_v36 = vld [vmem:[%s3849_s5 + $0x78] sm:$0xff]  ;;  %v1659_v38 = vld [vmem:[%s3849_s5 + $0x70] sm:$0xff] }
 0x1b5   :  { %1585 = vmatpush.msrb.mxu2 %v2313_v60  ;;  %1624 = vmatpush.msrb.mxu3 %v2329_v39  ;;  %v1658_v60 = vld [vmem:[%s3849_s5 + $0x68] sm:$0xff]  ;;  %v1657_v39 = vld [vmem:[%s3849_s5 + $0x60] sm:$0xff] }
 0x1b6   :  { %1508 = vmatpush.msrb.mxu0 %v2280_v40  ;;  %1547 = vmatpush.msrb.mxu1 %v2296_v41  ;;  %v1656_v40 = vld [vmem:[%s3849_s5 + $0x58] sm:$0xff]  ;;  %v1655_v41 = vld [vmem:[%s3849_s5 + $0x50] sm:$0xff] }
 0x1b7   :  { %1586 = vmatpush.msrb.mxu2 %v2312_v42  ;;  %1625 = vmatpush.msrb.mxu3 %v2328_v43  ;;  %v1654_v42 = vld [vmem:[%s3849_s5 + $0x48] sm:$0xff]  ;;  %v1653_v43 = vld [vmem:[%s3849_s5 + $0x40] sm:$0xff] }
 0x1b8   :  { %1509 = vmatpush.msrb.mxu0 %v2279_v56  ;;  %1548 = vmatpush.msrb.mxu1 %v2295_v63  ;;  %v2430_v56 = vld [vmem:[%s3848_s4] ss:$0 sm:$0xff]  ;;  %v1652_v63 = vld [vmem:[%s3849_s5 + $0x38] sm:$0xff] }
 0x1b9   :  { %1587 = vmatpush.msrb.mxu2 %v2311_v44  ;;  %1626 = vmatpush.msrb.mxu3 %v2327_v45 }
 0x1ba   :  { %1510 = vmatpush.msrb.mxu0 %v2278_v46  ;;  %1549 = vmatpush.msrb.mxu1 %v2294_v48 }
 0x1bb   :  { %1588 = vmatpush.msrb.mxu2 %v2310_v59  ;;  %1627 = vmatpush.msrb.mxu3 %v2326_v1 }
 0x1bc   :  { %1511 = vmatpush.msrb.mxu0 %v2277_v12  ;;  %1550 = vmatpush.msrb.mxu1 %v2293_v61  ;;  %v1651_v12 = vld [vmem:[%s3849_s5 + $0x30] sm:$0xff]  ;;  %v1650_v61 = vld [vmem:[%s3849_s5 + $0x28] sm:$0xff] }
 0x1bd   :  { %1589 = vmatpush.msrb.mxu2 %v2309_v47  ;;  %1628 = vmatpush.msrb.mxu3 %v2325_v51  ;;  %v1649_v51 = vld [vmem:[%s3849_s5 + $0x20] sm:$0xff] }
 0x1be   :  { %1512 = vmatpush.msrb.mxu0 %v2276_v0  ;;  %1551 = vmatpush.msrb.mxu1 %v2292_v49  ;;  %v1648_v49 = vld [vmem:[%s3849_s5 + $0x18] sm:$0xff] }
 0x1bf   :  { %1590 = vmatpush.msrb.mxu2 %v2308_v5  ;;  %1629 = vmatpush.msrb.mxu3 %v2324_v3 }
 0x1c0   :  { %1513 = vmatpush.msrb.mxu0 %v2275_v6  ;;  %1552 = vmatpush.msrb.mxu1 %v2291_v50  ;;  %v1647_v6 = vld [vmem:[%s3849_s5 + $0x10] sm:$0xff]  ;;  %v1646_v50 = vld [vmem:[%s3849_s5 + $0x8] sm:$0xff] }
 0x1c1   :  { %1591 = vmatpush.msrb.mxu2 %v2307_v7  ;;  %1630 = vmatpush.msrb.mxu3 %v2323_v9 }
 0x1c2   :  { %1514 = vmatpush.msrb.mxu0 %v2274_v52  ;;  %1553 = vmatpush.msrb.mxu1 %v2290_v10  ;;  %v1645_v52 = vld [vmem:[%s3849_s5] sm:$0xff] }
 0x1c3   :  { %1592 = vmatpush.msrb.mxu2 %v2306_v11  ;;  %1631 = vmatpush.msrb.mxu3 %v2322_v4 }
 0x1c4   :  { %1515 = vmatpush.msrb.mxu0 %v2273_v13  ;;  %1554 = vmatpush.msrb.mxu1 %v2289_v53 }
 0x1c5   :  { %1593 = vmatpush.msrb.mxu2 %v2305_v54  ;;  %1632 = vmatpush.msrb.mxu3 %v2321_v57 }
 0x1c6   :  { %1516 = vmatpush.msrb.mxu0 %v2272_v14  ;;  %1555 = vmatpush.msrb.mxu1 %v2288_v15 }
 0x1c7   :  { %1594 = vmatpush.msrb.mxu2 %v2304_v16  ;;  %1633 = vmatpush.msrb.mxu3 %v2320_v17 }
 0x1c8   :  { %1517 = vmatpush.msrb.mxu0 %v2271_v18  ;;  %1556 = vmatpush.msrb.mxu1 %v2287_v19 }
 0x1c9   :  { %1595 = vmatpush.msrb.mxu2 %v2303_v20  ;;  %1634 = vmatpush.msrb.mxu3 %v2319_v62 }
 0x1ca   :  { %1518 = vmatpush.msrb.mxu0 %v2270_v8  ;;  %1557 = vmatpush.msrb.mxu1 %v2286_v21 }
 0x1cb   :  { %1596 = vmatpush.msrb.mxu2 %v2302_v23  ;;  %1635 = vmatpush.msrb.mxu3 %v2318_v22 }
 0x1cc   :  { %1519 = vmatpush.msrb.mxu0 %v2269_v34  ;;  %1558 = vmatpush.msrb.mxu1 %v2285_v37 }
 0x1cd   :  { %1597 = vmatpush.msrb.mxu2 %v2301_v2  ;;  %1636 = vmatpush.msrb.mxu3 %v2317_v24  ;;  %v2431_v2 = vld [vmem:[%s3850_s6] ss:$0 sm:$0xff] }
 0x1ce   :  { %1520 = vmatpush.msrb.mxu0 %v2268_v25  ;;  %1559 = vmatpush.msrb.mxu1 %v2284_v26 }
 0x1cf   :  { %1598 = vmatpush.msrb.mxu2 %v2300_v55  ;;  %1637 = vmatpush.msrb.mxu3 %v2316_v58 }
 0x1d0   :  { %1521 = vmatpush.msrb.mxu0 %v2267_v27  ;;  %1560 = vmatpush.msrb.mxu1 %v2283_v28 }
 0x1d1   :  { %1599 = vmatpush.msrb.mxu2 %v2299_v29  ;;  %1638 = vmatpush.msrb.mxu3 %v2315_v30 }
 0x1d2   :  { %1522 = vmatmul.f32.vlgmr.msrb.gmra.mxu0 %v1488_v31  ;;  %1561 = vmatmul.f32.vlgmr.msrb.gmra.mxu1 %v1527_v32 }
 0x1d3   :  { %1600 = vmatmul.f32.vlgmr.msrb.gmra.mxu2 %v1566_v33  ;;  %1639 = vmatmul.f32.vlgmr.msrb.gmra.mxu3 %v1605_v35 }
 0x1d4   :  { %1665 = vmatpush.msra.mxu0 %v1660_v36 }
 0x1d6   :  { %1666 = vmatpush.msra.mxu0 %v1659_v38 }
 0x1d8   :  { %1667 = vmatpush.msra.mxu0 %v1658_v60 }
 0x1da   :  { %1668 = vmatpush.msra.mxu0 %v1657_v39 }
 0x1dc   :  { %1669 = vmatpush.msra.mxu0 %v1656_v40 }
 0x1de   :  { %1670 = vmatpush.msra.mxu0 %v1655_v41 }
 0x1e0   :  { %1671 = vmatpush.msra.mxu0 %v1654_v42 }
 0x1e2   :  { %1672 = vmatpush.msra.mxu0 %v1653_v43 }
 0x1e4   :  { %1673 = vmatpush.msra.mxu0 %v1652_v63 }
 0x1e6   :  { %1674 = vmatpush.msra.mxu0 %v1651_v12 }
 0x1e8   :  { %1675 = vmatpush.msra.mxu0 %v1650_v61 }
 0x1ea   :  { %1676 = vmatpush.msra.mxu0 %v1649_v51 }
 0x1ec   :  { %1677 = vmatpush.msra.mxu0 %v1648_v49 }
 0x1ee   :  { %1678 = vmatpush.msra.mxu0 %v1647_v6 }
 0x1f0   :  { %1679 = vmatpush.msra.mxu0 %v1646_v50 }
 0x1f2   :  { %1680 = vmatpush.msra.mxu0 %v1645_v52 }
 0x209   :  { %v1052_v44 = vpop.f32.mrf.mxu0  ;;  %v1094_v46 = vpop.f32.mrf.mxu1 }
 0x20a   :  { %v1058_v45 = vadd.f32 %v2430_v56, %v1052_v44 }
 0x20c   :  { %v1097_v59 = vadd.f32 %v1094_v46, %v1058_v45 }
 0x210   :  { %v1133_v48 = vpop.f32.mrf.mxu2  ;;  %v1172_v47 = vpop.f32.mrf.mxu3 }
 0x211   :  { %v1136_v1 = vadd.f32 %v1133_v48, %v1097_v59 }
 0x213   :  { %v1175_v0 = vadd.f32 %v1172_v47, %v1136_v1  ;;  %v1211_v5 = vpop.f32.mrf.mxu0  ;;  %v1250_v7 = vpop.f32.mrf.mxu1 }
 0x215   :  { %v1214_v3 = vadd.f32 %v1211_v5, %v1175_v0 }
 0x217   :  { %v1253_v9 = vadd.f32 %v1250_v7, %v1214_v3 }
 0x21a   :  { %v1289_v10 = vpop.f32.mrf.mxu2  ;;  %v1328_v4 = vpop.f32.mrf.mxu3 }
 0x21b   :  { %v1292_v11 = vadd.f32 %v1289_v10, %v1253_v9 }
 0x21d   :  { %v1331_v53 = vadd.f32 %v1328_v4, %v1292_v11 }
 0x22d   :  { %v1367_v13 = vpop.f32.mrf.mxu0  ;;  %v1406_v57 = vpop.f32.mrf.mxu1 }
 0x22e   :  { %v1370_v54 = vadd.f32 %v1367_v13, %v1331_v53 }
 0x230   :  { %v1409_v15 = vadd.f32 %v1406_v57, %v1370_v54 }
 0x234   :  { %v1445_v14 = vpop.f32.mrf.mxu2  ;;  %v1484_v17 = vpop.f32.mrf.mxu3 }
 0x235   :  { %v1448_v16 = vadd.f32 %v1445_v14, %v1409_v15 }
 0x237   :  { %v1487_v18 = vadd.f32 %v1484_v17, %v1448_v16 }
 0x24f   :  { %v1523_v19 = vpop.f32.mrf.mxu0  ;;  %v1562_v62 = vpop.f32.mrf.mxu1 }
 0x250   :  { %v1526_v20 = vadd.f32 %v1523_v19, %v1487_v18 }
 0x252   :  { %v1565_v8 = vadd.f32 %v1562_v62, %v1526_v20 }
 0x256   :  { %v1601_v21 = vpop.f32.mrf.mxu2  ;;  %v1640_v22 = vpop.f32.mrf.mxu3 }
 0x257   :  { %v1604_v23 = vadd.f32 %v1601_v21, %v1565_v8 }
 0x259   :  { %v1643_v34 = vadd.f32 %v1640_v22, %v1604_v23 }
 0x25b   :  { %v1644_v37 = vmax.f32 %v1643_v34, 0.0 }
 0x25d   :  { %1681 = vmatmul.f32.vlgmr.msra.gmra.mxu0 %v1644_v37 }
 0x2da   :  { %v1682_v24 = vpop.f32.mrf.mxu0 }
 0x2db   :  { %v1683_v25 = vadd.f32 %v2431_v2, %v1682_v24 }
 0x2dd   :  { %v1685_v26 = vmax.f32 %v1683_v25, 0.0 }
 0x2df   :  { %1686 = vst [vmem:[#allocation3] sm:$0x3] %v1685_v26 }
 0x2e0   :  { %1699 = dma.vmem_to_hbm [thread:$0]  %s1695_s10, 32, %s1697_s13, [#allocation4]  }
 0x2e1   :  { %2456 = dma.done.wait [#allocation4], 32  }
 0x2e2   :  { %2457 = vsyncadd [#allocation4], 4294967264 }
 0x2e3   :  { %1706 = vsyncpa [#allocation4], 1 }

</bundles_post_ra>
